<compile_context>
chip_gen: v7x
topology: tpu7x:2x2x1
jax: 0.10.0
libtpu: 0.0.40
codegen_flags: <defaults>
</compile_context>

<pallas_src>
import functools

import jax
import jax.numpy as jnp
from jax.experimental import pallas as pl
from jax.experimental.pallas import tpu as pltpu

NUM_BOND_DIRECTION = 3
NUM_BOND_TYPE = 5
NUM_ATOM_TYPE = 119
NUM_CHIRALITY_TAG = 4

BN_EPS = 1e-5
OUT_PAD = 128          # lane-dense logits block; real logits sliced in wrapper


def _round_up(x, m):
    return (x + m - 1) // m * m


def _masked_bn(x, gamma, beta, mask, count):
    """BatchNorm1d forward, training-mode (biased) batch stats over `count` valid rows."""
    inv = 1.0 / float(count)
    mean = jnp.sum(x * mask, axis=0, keepdims=True) * inv
    var = jnp.sum(jnp.square(x - mean) * mask, axis=0, keepdims=True) * inv
    return (x - mean) * jax.lax.rsqrt(var + BN_EPS) * gamma + beta


# ------------------------------ fused kernel ---------------------------------

def _make_fused_kernel(n_pad, n_real, g_pad, g_real):
    def kernel(a_ref, h0_ref, p_ref,
               esum_ref, w1_ref, b1_ref, w2_ref, b2_ref, gm_ref, bt_ref,
               wp1_ref, g1_ref, be1_ref,
               wp2_ref, g2_ref, be2_ref,
               wp3_ref, g3_ref, be3_ref,
               wo1_ref, bo1_ref, wo2_ref, bo2_ref,
               out_ref, h_scr):
        l = pl.program_id(0)
        n_layers = pl.num_programs(0)

        @pl.when(l == 0)
        def _():
            h_scr[...] = h0_ref[...]

        node_mask = (jax.lax.broadcasted_iota(jnp.int32, (n_pad, 1), 0)
                     < n_real).astype(jnp.float32)

        # --- GINEConv (aggr='add'): sum_j (h_j + e_emb_ij) == A @ h + esum ---
        h = h_scr[...]                                           # bf16 [Np, D]
        agg = (jnp.dot(a_ref[...], h, preferred_element_type=jnp.float32)
               + esum_ref[0].astype(jnp.float32))
        # update(): Linear(D, 2D) -> ReLU -> Linear(2D, D)
        z = jnp.dot(agg.astype(jnp.bfloat16), w1_ref[0],
                    preferred_element_type=jnp.float32) + b1_ref[0]
        z = jnp.maximum(z, 0.0)
        z = jnp.dot(z.astype(jnp.bfloat16), w2_ref[0],
                    preferred_element_type=jnp.float32) + b2_ref[0]
        # BatchNorm1d (batch stats over real nodes) -> ReLU -> Dropout(p=0)
        z = _masked_bn(z, gm_ref[0], bt_ref[0], node_mask, n_real)
        z = jnp.maximum(z, 0.0) * node_mask
        h_scr[...] = z.astype(jnp.bfloat16)

        # --------- epilogue on last layer: pool + proj_head + output ---------
        @pl.when(l == n_layers - 1)
        def _():
            graph_mask = (jax.lax.broadcasted_iota(jnp.int32, (g_pad, 1), 0)
                          < g_real).astype(jnp.float32)
            # global_mean_pool as a matmul
            pooled = jnp.dot(p_ref[...], z.astype(jnp.bfloat16),
                             preferred_element_type=jnp.float32)
            # proj_head: [Linear(no bias) -> BN -> ReLU] x2, Linear(no bias) -> BN
            y = jnp.dot(pooled.astype(jnp.bfloat16), wp1_ref[...],
                        preferred_element_type=jnp.float32)
            y = jnp.maximum(_masked_bn(y, g1_ref[...], be1_ref[...],
                                       graph_mask, g_real), 0.0)
            y = jnp.dot(y.astype(jnp.bfloat16), wp2_ref[...],
                        preferred_element_type=jnp.float32)
            y = jnp.maximum(_masked_bn(y, g2_ref[...], be2_ref[...],
                                       graph_mask, g_real), 0.0)
            y = jnp.dot(y.astype(jnp.bfloat16), wp3_ref[...],
                        preferred_element_type=jnp.float32)
            y = _masked_bn(y, g3_ref[...], be3_ref[...], graph_mask, g_real)
            # output_layers: Linear -> Softplus -> Linear
            y = jnp.dot(y.astype(jnp.bfloat16), wo1_ref[...],
                        preferred_element_type=jnp.float32) + bo1_ref[...]
            y = jnp.maximum(y, 0.0) + jnp.log(1.0 + jnp.exp(-jnp.abs(y)))
            out_ref[...] = (jnp.dot(y.astype(jnp.bfloat16), wo2_ref[...],
                                    preferred_element_type=jnp.float32)
                            + bo2_ref[...])

    return kernel


def _resident_spec(shape):
    zeros = (0,) * len(shape)
    return pl.BlockSpec(tuple(shape), lambda l: zeros)


def _layered_spec(shape):
    zeros = (0,) * len(shape)
    return pl.BlockSpec((1,) + tuple(shape), lambda l: (l,) + zeros)


# --------------------------- parameter init ----------------------------------

def xavier_uniform(key, shape):
    bound = (6.0 / (shape[0] + shape[1])) ** 0.5
    return jax.random.uniform(key, shape, jnp.float32, -bound, bound)


def linear_params(key, fan_in, fan_out, bias=True):
    kw, kb = jax.random.split(key)
    bound = 1.0 / (fan_in ** 0.5)
    w = jax.random.uniform(kw, (fan_in, fan_out), jnp.float32, -bound, bound)
    if not bias:
        return w
    b = jax.random.uniform(kb, (1, fan_out), jnp.float32, -bound, bound)
    return w, b


def init_params(key, embed_dim, num_layer, task="classification"):
    D = embed_dim
    keys = iter(jax.random.split(key, 2 + 4 * num_layer + 5))
    p = {"x_emb1": xavier_uniform(next(keys), (NUM_ATOM_TYPE, D)),
         "x_emb2": xavier_uniform(next(keys), (NUM_CHIRALITY_TAG, D)),
         "layers": []}
    for _ in range(num_layer):
        ee1 = xavier_uniform(next(keys), (NUM_BOND_TYPE, D))
        ee2 = xavier_uniform(next(keys), (NUM_BOND_DIRECTION, D))
        w1, b1 = linear_params(next(keys), D, 2 * D)
        w2, b2 = linear_params(next(keys), 2 * D, D)
        p["layers"].append(dict(
            ee1=ee1, ee2=ee2, w1=w1, b1=b1, w2=w2, b2=b2,
            gamma=jnp.ones((1, D), jnp.float32),
            beta=jnp.zeros((1, D), jnp.float32)))
    p["wp1"] = linear_params(next(keys), D, D, bias=False)
    p["wp2"] = linear_params(next(keys), D, D, bias=False)
    p["wp3"] = linear_params(next(keys), D, D, bias=False)
    for i in (1, 2, 3):
        p[f"g{i}"] = jnp.ones((1, D), jnp.float32)
        p[f"be{i}"] = jnp.zeros((1, D), jnp.float32)
    p["wo1"], p["bo1"] = linear_params(next(keys), D, D // 2)
    n_out = 2 if task == "classification" else 1
    p["wo2"], p["bo2"] = linear_params(next(keys), D // 2, n_out)
    return p


# ------------------------------ forward --------------------------------------

@functools.partial(jax.jit, static_argnames=("num_graphs",))
def ginet_forward(params, x, edge_index, edge_attr, batch, num_graphs):
    N = x.shape[0]
    E = edge_index.shape[1]
    D = params["x_emb1"].shape[1]
    L = len(params["layers"])
    G = num_graphs

    Np = max(_round_up(N, 8), 8)
    Gp = max(_round_up(G, 8), 8)

    f32, bf16 = jnp.float32, jnp.bfloat16

    # node embeddings (gather glue), zero-padded rows
    h0 = (jnp.take(params["x_emb1"], x[:, 0], axis=0)
          + jnp.take(params["x_emb2"], x[:, 1], axis=0))                 # [N, D]
    h0 = jnp.zeros((Np, D), f32).at[:N].set(h0).astype(bf16)

    # add self loops (type=4, direction=0)
    loop = jnp.arange(N, dtype=edge_index.dtype)
    src = jnp.concatenate([edge_index[0], loop])
    dst = jnp.concatenate([edge_index[1], loop])
    bond_type = jnp.concatenate([edge_attr[:, 0],
                                 jnp.full((N,), 4, edge_attr.dtype)])
    bond_dir = jnp.concatenate([edge_attr[:, 1],
                                jnp.zeros((N,), edge_attr.dtype)])

    # dense adjacency A[dst, src] += 1 (small ints -> exact in bf16)
    A = jnp.zeros((Np, Np), f32).at[dst, src].add(1.0).astype(bf16)

    # per-layer destination-summed edge embeddings (replaces dense scatter matmul)
    esum = jnp.stack([
        jax.ops.segment_sum(
            jnp.take(lp["ee1"], bond_type, axis=0)
            + jnp.take(lp["ee2"], bond_dir, axis=0),
            dst, num_segments=Np)
        for lp in params["layers"]]).astype(bf16)                        # [L, Np, D]

    # stacked per-layer GIN MLP / BN params
    W1 = jnp.stack([lp["w1"] for lp in params["layers"]]).astype(bf16)   # [L, D, 2D]
    B1 = jnp.stack([lp["b1"] for lp in params["layers"]])                # [L, 1, 2D]
    W2 = jnp.stack([lp["w2"] for lp in params["layers"]]).astype(bf16)   # [L, 2D, D]
    B2 = jnp.stack([lp["b2"] for lp in params["layers"]])                # [L, 1, D]
    GM = jnp.stack([lp["gamma"] for lp in params["layers"]])             # [L, 1, D]
    BT = jnp.stack([lp["beta"] for lp in params["layers"]])              # [L, 1, D]

    # mean-pool matrix, zero-padded
    onehot = (batch[None, :] == jnp.arange(G, dtype=batch.dtype)[:, None]
              ).astype(f32)                                              # [G, N]
    counts = jnp.maximum(jnp.sum(onehot, axis=1, keepdims=True), 1.0)
    P = jnp.zeros((Gp, Np), f32).at[:G, :N].set(onehot / counts).astype(bf16)

    # head params (lane-pad the tiny logits dim to OUT_PAD; sliced after the call)
    n_out = params["wo2"].shape[1]
    wo2 = jnp.zeros((params["wo2"].shape[0], OUT_PAD), f32
                    ).at[:, :n_out].set(params["wo2"]).astype(bf16)
    bo2 = jnp.zeros((1, OUT_PAD), f32).at[:, :n_out].set(params["bo2"])

    head_args = (
        params["wp1"].astype(bf16), params["g1"], params["be1"],
        params["wp2"].astype(bf16), params["g2"], params["be2"],
        params["wp3"].astype(bf16), params["g3"], params["be3"],
        params["wo1"].astype(bf16), params["bo1"], wo2, bo2,
    )

    kernel = _make_fused_kernel(Np, N, Gp, G)

    in_specs = (
        [_resident_spec((Np, Np)),       # A        (resident across layers)
         _resident_spec((Np, D)),        # h0
         _resident_spec((Gp, Np))]       # P
        + [_layered_spec(a.shape[1:]) for a in (esum, W1, B1, W2, B2, GM, BT)]
        + [_resident_spec(a.shape) for a in head_args]
    )

    out = pl.pallas_call(
        kernel,
        out_shape=jax.ShapeDtypeStruct((Gp, OUT_PAD), jnp.float32),
        grid=(L,),
        in_specs=in_specs,
        out_specs=_resident_spec((Gp, OUT_PAD)),
        scratch_shapes=[pltpu.VMEM((Np, D), bf16)],   # h carried across layers
        compiler_params=pltpu.CompilerParams(
            dimension_semantics=("arbitrary",),
            vmem_limit_bytes=32 * 1024 * 1024),
    )(A, h0, P, esum, W1, B1, W2, B2, GM, BT, *head_args)

    return out[:G, :n_out]


# -------------------------------- main ----------------------------------------

if __name__ == "__main__":
    key = jax.random.PRNGKey(0)
    # D lane-aligned (128); N is already a multiple of 8.
    N, E, D, G, L = 16, 24, 128, 2, 5
    k_param, k_atom, k_chir, k_src, k_dst, k_bt, k_bd = jax.random.split(key, 7)

    params = init_params(k_param, embed_dim=D, num_layer=L)

    x = jnp.stack(
        [jax.random.randint(k_atom, (N,), 0, NUM_ATOM_TYPE),
         jax.random.randint(k_chir, (N,), 0, NUM_CHIRALITY_TAG)], axis=1
    ).astype(jnp.int32)                                      # [N, 2]
    edge_index = jnp.stack(
        [jax.random.randint(k_src, (E,), 0, N),
         jax.random.randint(k_dst, (E,), 0, N)], axis=0
    ).astype(jnp.int32)                                      # [2, E]
    edge_attr = jnp.stack(
        [jax.random.randint(k_bt, (E,), 0, NUM_BOND_TYPE - 1),   # 4 = self-loop type
         jax.random.randint(k_bd, (E,), 0, NUM_BOND_DIRECTION)], axis=1
    ).astype(jnp.int32)                                      # [E, 2]
    batch = jnp.concatenate(
        [jnp.zeros((N // 2,), jnp.int32), jnp.ones((N - N // 2,), jnp.int32)])

    out = ginet_forward(params, x, edge_index, edge_attr, batch, num_graphs=G)
    out = jax.block_until_ready(out)
    assert out.shape == (G, 2) and out.dtype == jnp.float32
    print("KERNEL_OK")
</pallas_src>

<mosaic_0001>
module attributes {stable_mosaic.version = 11 : i64} {
  func.func @kernel(%arg0: i32, %arg1: memref<16x16xbf16, #tpu.memory_space<vmem>>, %arg2: memref<16x128xbf16, #tpu.memory_space<vmem>>, %arg3: memref<8x16xbf16, #tpu.memory_space<vmem>>, %arg4: memref<1x16x128xbf16, #tpu.memory_space<vmem>>, %arg5: memref<1x128x256xbf16, #tpu.memory_space<vmem>>, %arg6: memref<1x1x256xf32, #tpu.memory_space<vmem>>, %arg7: memref<1x256x128xbf16, #tpu.memory_space<vmem>>, %arg8: memref<1x1x128xf32, #tpu.memory_space<vmem>>, %arg9: memref<1x1x128xf32, #tpu.memory_space<vmem>>, %arg10: memref<1x1x128xf32, #tpu.memory_space<vmem>>, %arg11: memref<128x128xbf16, #tpu.memory_space<vmem>>, %arg12: memref<1x128xf32, #tpu.memory_space<vmem>>, %arg13: memref<1x128xf32, #tpu.memory_space<vmem>>, %arg14: memref<128x128xbf16, #tpu.memory_space<vmem>>, %arg15: memref<1x128xf32, #tpu.memory_space<vmem>>, %arg16: memref<1x128xf32, #tpu.memory_space<vmem>>, %arg17: memref<128x128xbf16, #tpu.memory_space<vmem>>, %arg18: memref<1x128xf32, #tpu.memory_space<vmem>>, %arg19: memref<1x128xf32, #tpu.memory_space<vmem>>, %arg20: memref<128x64xbf16, #tpu.memory_space<vmem>>, %arg21: memref<1x64xf32, #tpu.memory_space<vmem>>, %arg22: memref<64x128xbf16, #tpu.memory_space<vmem>>, %arg23: memref<1x128xf32, #tpu.memory_space<vmem>>, %arg24: memref<8x128xf32, #tpu.memory_space<vmem>>, %arg25: memref<16x128xbf16, #tpu.memory_space<vmem>>) attributes {dimension_semantics = [#tpu.dimension_semantics<arbitrary>], iteration_bounds = array<i64: 5>, scalar_prefetch = 0 : i64, scratch_operands = 1 : i64, tpu.core_type = #tpu.core_type<tc>, window_params = [{pipeline_mode = #tpu.pipeline_mode<synchronous>, transform_indices = @transform_0, window_bounds = array<i64: 16, 16>}, {pipeline_mode = #tpu.pipeline_mode<synchronous>, transform_indices = @transform_1, window_bounds = array<i64: 16, 128>}, {pipeline_mode = #tpu.pipeline_mode<synchronous>, transform_indices = @transform_2, window_bounds = array<i64: 8, 16>}, {transform_indices = @transform_3, window_bounds = array<i64: 1, 16, 128>}, {transform_indices = @transform_4, window_bounds = array<i64: 1, 128, 256>}, {transform_indices = @transform_5, window_bounds = array<i64: 1, 1, 256>}, {transform_indices = @transform_6, window_bounds = array<i64: 1, 256, 128>}, {transform_indices = @transform_7, window_bounds = array<i64: 1, 1, 128>}, {transform_indices = @transform_8, window_bounds = array<i64: 1, 1, 128>}, {transform_indices = @transform_9, window_bounds = array<i64: 1, 1, 128>}, {pipeline_mode = #tpu.pipeline_mode<synchronous>, transform_indices = @transform_10, window_bounds = array<i64: 128, 128>}, {pipeline_mode = #tpu.pipeline_mode<synchronous>, transform_indices = @transform_11, window_bounds = array<i64: 1, 128>}, {pipeline_mode = #tpu.pipeline_mode<synchronous>, transform_indices = @transform_12, window_bounds = array<i64: 1, 128>}, {pipeline_mode = #tpu.pipeline_mode<synchronous>, transform_indices = @transform_13, window_bounds = array<i64: 128, 128>}, {pipeline_mode = #tpu.pipeline_mode<synchronous>, transform_indices = @transform_14, window_bounds = array<i64: 1, 128>}, {pipeline_mode = #tpu.pipeline_mode<synchronous>, transform_indices = @transform_15, window_bounds = array<i64: 1, 128>}, {pipeline_mode = #tpu.pipeline_mode<synchronous>, transform_indices = @transform_16, window_bounds = array<i64: 128, 128>}, {pipeline_mode = #tpu.pipeline_mode<synchronous>, transform_indices = @transform_17, window_bounds = array<i64: 1, 128>}, {pipeline_mode = #tpu.pipeline_mode<synchronous>, transform_indices = @transform_18, window_bounds = array<i64: 1, 128>}, {pipeline_mode = #tpu.pipeline_mode<synchronous>, transform_indices = @transform_19, window_bounds = array<i64: 128, 64>}, {pipeline_mode = #tpu.pipeline_mode<synchronous>, transform_indices = @transform_20, window_bounds = array<i64: 1, 64>}, {pipeline_mode = #tpu.pipeline_mode<synchronous>, transform_indices = @transform_21, window_bounds = array<i64: 64, 128>}, {pipeline_mode = #tpu.pipeline_mode<synchronous>, transform_indices = @transform_22, window_bounds = array<i64: 1, 128>}, {pipeline_mode = #tpu.pipeline_mode<synchronous>, transform_indices = @transform_23, window_bounds = array<i64: 8, 128>}]} {
    %c0_i32 = arith.constant 0 : i32
    %0 = arith.cmpi eq, %arg0, %c0_i32 : i32
    %1 = arith.extui %0 : i1 to i32
    %c0_i32_0 = arith.constant 0 : i32
    %2 = arith.cmpi ne, %1, %c0_i32_0 : i32
    scf.if %2 {
      %c0_37 = arith.constant 0 : index
      %c0_38 = arith.constant 0 : index
      %72 = vector.load %arg2[%c0_37, %c0_38] : memref<16x128xbf16, #tpu.memory_space<vmem>>, vector<16x128xbf16>
      %c0_39 = arith.constant 0 : index
      %c0_40 = arith.constant 0 : index
      %73 = vector.load %arg25[%c0_39, %c0_40] : memref<16x128xbf16, #tpu.memory_space<vmem>>, vector<16x128xbf16>
      tpu.vector_store %arg25[%c0_39, %c0_40], %72 {strides = array<i32>} : memref<16x128xbf16, #tpu.memory_space<vmem>>, vector<16x128xbf16>,
    } else {
    }
    %3 = tpu.iota {dimensions = array<i32: 0>} : vector<16x1xi32>
    %c16_i32 = arith.constant 16 : i32
    %4 = vector.broadcast %c16_i32 : i32 to vector<16x1xi32>
    %5 = arith.cmpi slt, %3, %4 : vector<16x1xi32>
    %6 = arith.extui %5 : vector<16x1xi1> to vector<16x1xi32>
    %7 = arith.sitofp %6 : vector<16x1xi32> to vector<16x1xf32>
    %c0 = arith.constant 0 : index
    %c0_1 = arith.constant 0 : index
    %8 = vector.load %arg25[%c0, %c0_1] : memref<16x128xbf16, #tpu.memory_space<vmem>>, vector<16x128xbf16>
    %c0_2 = arith.constant 0 : index
    %c0_3 = arith.constant 0 : index
    %9 = vector.load %arg1[%c0_2, %c0_3] : memref<16x16xbf16, #tpu.memory_space<vmem>>, vector<16x16xbf16>
    %cst = arith.constant dense<0.000000e+00> : vector<16x128xf32>
    %10 = tpu.matmul %9, %8, %cst {dimension_numbers = #tpu.dot_dimension_numbers<[1], [0], [0], [1], [0, 0, 1, 1], [], []>} : vector<16x16xbf16>, vector<16x128xbf16>, vector<16x128xf32> -> vector<16x128xf32>
    %c0_4 = arith.constant 0 : index
    %c0_5 = arith.constant 0 : index
    %c0_6 = arith.constant 0 : index
    %11 = vector.load %arg4[%c0_4, %c0_5, %c0_6] : memref<1x16x128xbf16, #tpu.memory_space<vmem>>, vector<1x16x128xbf16>
    %12 = vector.shape_cast %11 : vector<1x16x128xbf16> to vector<16x128xbf16>
    %13 = arith.extf %12 : vector<16x128xbf16> to vector<16x128xf32>
    %14 = arith.addf %10, %13 : vector<16x128xf32>
    %15 = arith.truncf %14 : vector<16x128xf32> to vector<16x128xbf16>
    %c0_7 = arith.constant 0 : index
    %c0_8 = arith.constant 0 : index
    %c0_9 = arith.constant 0 : index
    %16 = vector.load %arg5[%c0_7, %c0_8, %c0_9] : memref<1x128x256xbf16, #tpu.memory_space<vmem>>, vector<1x128x256xbf16>
    %17 = vector.shape_cast %16 : vector<1x128x256xbf16> to vector<128x256xbf16>
    %cst_10 = arith.constant dense<0.000000e+00> : vector<16x256xf32>
    %18 = tpu.matmul %15, %17, %cst_10 {dimension_numbers = #tpu.dot_dimension_numbers<[1], [0], [0], [1], [0, 0, 1, 1], [], []>} : vector<16x128xbf16>, vector<128x256xbf16>, vector<16x256xf32> -> vector<16x256xf32>
    %c0_11 = arith.constant 0 : index
    %c0_12 = arith.constant 0 : index
    %c0_13 = arith.constant 0 : index
    %19 = vector.load %arg6[%c0_11, %c0_12, %c0_13] : memref<1x1x256xf32, #tpu.memory_space<vmem>>, vector<1x1x256xf32>
    %20 = vector.shape_cast %19 : vector<1x1x256xf32> to vector<1x256xf32>
    %21 = vector.broadcast %20 : vector<1x256xf32> to vector<16x256xf32>
    %22 = arith.addf %18, %21 : vector<16x256xf32>
    %cst_14 = arith.constant 0.000000e+00 : f32
    %23 = vector.broadcast %cst_14 : f32 to vector<16x256xf32>
    %24 = arith.maximumf %22, %23 : vector<16x256xf32>
    %25 = arith.truncf %24 : vector<16x256xf32> to vector<16x256xbf16>
    %c0_15 = arith.constant 0 : index
    %c0_16 = arith.constant 0 : index
    %c0_17 = arith.constant 0 : index
    %26 = vector.load %arg7[%c0_15, %c0_16, %c0_17] : memref<1x256x128xbf16, #tpu.memory_space<vmem>>, vector<1x256x128xbf16>
    %27 = vector.shape_cast %26 : vector<1x256x128xbf16> to vector<256x128xbf16>
    %cst_18 = arith.constant dense<0.000000e+00> : vector<16x128xf32>
    %28 = tpu.matmul %25, %27, %cst_18 {dimension_numbers = #tpu.dot_dimension_numbers<[1], [0], [0], [1], [0, 0, 1, 1], [], []>} : vector<16x256xbf16>, vector<256x128xbf16>, vector<16x128xf32> -> vector<16x128xf32>
    %c0_19 = arith.constant 0 : index
    %c0_20 = arith.constant 0 : index
    %c0_21 = arith.constant 0 : index
    %29 = vector.load %arg8[%c0_19, %c0_20, %c0_21] : memref<1x1x128xf32, #tpu.memory_space<vmem>>, vector<1x1x128xf32>
    %30 = vector.shape_cast %29 : vector<1x1x128xf32> to vector<1x128xf32>
    %31 = vector.broadcast %30 : vector<1x128xf32> to vector<16x128xf32>
    %32 = arith.addf %28, %31 : vector<16x128xf32>
    %c0_22 = arith.constant 0 : index
    %c0_23 = arith.constant 0 : index
    %c0_24 = arith.constant 0 : index
    %33 = vector.load %arg9[%c0_22, %c0_23, %c0_24] : memref<1x1x128xf32, #tpu.memory_space<vmem>>, vector<1x1x128xf32>
    %34 = vector.shape_cast %33 : vector<1x1x128xf32> to vector<1x128xf32>
    %c0_25 = arith.constant 0 : index
    %c0_26 = arith.constant 0 : index
    %c0_27 = arith.constant 0 : index
    %35 = vector.load %arg10[%c0_25, %c0_26, %c0_27] : memref<1x1x128xf32, #tpu.memory_space<vmem>>, vector<1x1x128xf32>
    %36 = vector.shape_cast %35 : vector<1x1x128xf32> to vector<1x128xf32>
    %37 = vector.broadcast %7 : vector<16x1xf32> to vector<16x128xf32>
    %38 = arith.mulf %32, %37 : vector<16x128xf32>
    %cst_28 = arith.constant dense<0.000000e+00> : vector<128xf32>
    %39 = vector.multi_reduction <add>, %38, %cst_28 [0] : vector<16x128xf32> to vector<128xf32>
    %40 = vector.shape_cast %39 : vector<128xf32> to vector<1x128xf32>
    %cst_29 = arith.constant 6.250000e-02 : f32
    %41 = vector.broadcast %cst_29 : f32 to vector<1x128xf32>
    %42 = arith.mulf %40, %41 : vector<1x128xf32>
    %43 = vector.broadcast %42 : vector<1x128xf32> to vector<16x128xf32>
    %44 = arith.subf %32, %43 : vector<16x128xf32>
    %45 = arith.mulf %44, %44 : vector<16x128xf32>
    %46 = vector.broadcast %7 : vector<16x1xf32> to vector<16x128xf32>
    %47 = arith.mulf %45, %46 : vector<16x128xf32>
    %cst_30 = arith.constant dense<0.000000e+00> : vector<128xf32>
    %48 = vector.multi_reduction <add>, %47, %cst_30 [0] : vector<16x128xf32> to vector<128xf32>
    %49 = vector.shape_cast %48 : vector<128xf32> to vector<1x128xf32>
    %cst_31 = arith.constant 6.250000e-02 : f32
    %50 = vector.broadcast %cst_31 : f32 to vector<1x128xf32>
    %51 = arith.mulf %49, %50 : vector<1x128xf32>
    %52 = vector.broadcast %42 : vector<1x128xf32> to vector<16x128xf32>
    %53 = arith.subf %32, %52 : vector<16x128xf32>
    %cst_32 = arith.constant 9.99999974E-6 : f32
    %54 = vector.broadcast %cst_32 : f32 to vector<1x128xf32>
    %55 = arith.addf %51, %54 : vector<1x128xf32>
    %56 = math.rsqrt %55 : vector<1x128xf32>
    %57 = vector.broadcast %56 : vector<1x128xf32> to vector<16x128xf32>
    %58 = arith.mulf %53, %57 : vector<16x128xf32>
    %59 = vector.broadcast %34 : vector<1x128xf32> to vector<16x128xf32>
    %60 = arith.mulf %58, %59 : vector<16x128xf32>
    %61 = vector.broadcast %36 : vector<1x128xf32> to vector<16x128xf32>
    %62 = arith.addf %60, %61 : vector<16x128xf32>
    %cst_33 = arith.constant 0.000000e+00 : f32
    %63 = vector.broadcast %cst_33 : f32 to vector<16x128xf32>
    %64 = arith.maximumf %62, %63 : vector<16x128xf32>
    %65 = vector.broadcast %7 : vector<16x1xf32> to vector<16x128xf32>
    %66 = arith.mulf %64, %65 : vector<16x128xf32>
    %67 = arith.truncf %66 : vector<16x128xf32> to vector<16x128xbf16>
    %c0_34 = arith.constant 0 : index
    %c0_35 = arith.constant 0 : index
    %68 = vector.load %arg25[%c0_34, %c0_35] : memref<16x128xbf16, #tpu.memory_space<vmem>>, vector<16x128xbf16>
    tpu.vector_store %arg25[%c0_34, %c0_35], %67 {strides = array<i32>} : memref<16x128xbf16, #tpu.memory_space<vmem>>, vector<16x128xbf16>,
    %c4_i32 = arith.constant 4 : i32
    %69 = arith.cmpi eq, %arg0, %c4_i32 : i32
    %70 = arith.extui %69 : i1 to i32
    %c0_i32_36 = arith.constant 0 : i32
    %71 = arith.cmpi ne, %70, %c0_i32_36 : i32
    scf.if %71 {
      %72 = tpu.iota {dimensions = array<i32: 0>} : vector<8x1xi32>
      %c2_i32 = arith.constant 2 : i32
      %73 = vector.broadcast %c2_i32 : i32 to vector<8x1xi32>
      %74 = arith.cmpi slt, %72, %73 : vector<8x1xi32>
      %75 = arith.extui %74 : vector<8x1xi1> to vector<8x1xi32>
      %76 = arith.sitofp %75 : vector<8x1xi32> to vector<8x1xf32>
      %c0_37 = arith.constant 0 : index
      %c0_38 = arith.constant 0 : index
      %77 = vector.load %arg3[%c0_37, %c0_38] : memref<8x16xbf16, #tpu.memory_space<vmem>>, vector<8x16xbf16>
      %78 = arith.truncf %66 : vector<16x128xf32> to vector<16x128xbf16>
      %cst_39 = arith.constant dense<0.000000e+00> : vector<8x128xf32>
      %79 = tpu.matmul %77, %78, %cst_39 {dimension_numbers = #tpu.dot_dimension_numbers<[1], [0], [0], [1], [0, 0, 1, 1], [], []>} : vector<8x16xbf16>, vector<16x128xbf16>, vector<8x128xf32> -> vector<8x128xf32>
      %80 = arith.truncf %79 : vector<8x128xf32> to vector<8x128xbf16>
      %c0_40 = arith.constant 0 : index
      %c0_41 = arith.constant 0 : index
      %81 = vector.load %arg11[%c0_40, %c0_41] : memref<128x128xbf16, #tpu.memory_space<vmem>>, vector<128x128xbf16>
      %cst_42 = arith.constant dense<0.000000e+00> : vector<8x128xf32>
      %82 = tpu.matmul %80, %81, %cst_42 {dimension_numbers = #tpu.dot_dimension_numbers<[1], [0], [0], [1], [0, 0, 1, 1], [], []>} : vector<8x128xbf16>, vector<128x128xbf16>, vector<8x128xf32> -> vector<8x128xf32>
      %c0_43 = arith.constant 0 : index
      %c0_44 = arith.constant 0 : index
      %83 = vector.load %arg12[%c0_43, %c0_44] : memref<1x128xf32, #tpu.memory_space<vmem>>, vector<1x128xf32>
      %c0_45 = arith.constant 0 : index
      %c0_46 = arith.constant 0 : index
      %84 = vector.load %arg13[%c0_45, %c0_46] : memref<1x128xf32, #tpu.memory_space<vmem>>, vector<1x128xf32>
      %85 = vector.broadcast %76 : vector<8x1xf32> to vector<8x128xf32>
      %86 = arith.mulf %82, %85 : vector<8x128xf32>
      %cst_47 = arith.constant dense<0.000000e+00> : vector<128xf32>
      %87 = vector.multi_reduction <add>, %86, %cst_47 [0] : vector<8x128xf32> to vector<128xf32>
      %88 = vector.shape_cast %87 : vector<128xf32> to vector<1x128xf32>
      %cst_48 = arith.constant 5.000000e-01 : f32
      %89 = vector.broadcast %cst_48 : f32 to vector<1x128xf32>
      %90 = arith.mulf %88, %89 : vector<1x128xf32>
      %91 = vector.broadcast %90 : vector<1x128xf32> to vector<8x128xf32>
      %92 = arith.subf %82, %91 : vector<8x128xf32>
      %93 = arith.mulf %92, %92 : vector<8x128xf32>
      %94 = vector.broadcast %76 : vector<8x1xf32> to vector<8x128xf32>
      %95 = arith.mulf %93, %94 : vector<8x128xf32>
      %cst_49 = arith.constant dense<0.000000e+00> : vector<128xf32>
      %96 = vector.multi_reduction <add>, %95, %cst_49 [0] : vector<8x128xf32> to vector<128xf32>
      %97 = vector.shape_cast %96 : vector<128xf32> to vector<1x128xf32>
      %cst_50 = arith.constant 5.000000e-01 : f32
      %98 = vector.broadcast %cst_50 : f32 to vector<1x128xf32>
      %99 = arith.mulf %97, %98 : vector<1x128xf32>
      %100 = vector.broadcast %90 : vector<1x128xf32> to vector<8x128xf32>
      %101 = arith.subf %82, %100 : vector<8x128xf32>
      %cst_51 = arith.constant 9.99999974E-6 : f32
      %102 = vector.broadcast %cst_51 : f32 to vector<1x128xf32>
      %103 = arith.addf %99, %102 : vector<1x128xf32>
      %104 = math.rsqrt %103 : vector<1x128xf32>
      %105 = vector.broadcast %104 : vector<1x128xf32> to vector<8x128xf32>
      %106 = arith.mulf %101, %105 : vector<8x128xf32>
      %107 = vector.broadcast %83 : vector<1x128xf32> to vector<8x128xf32>
      %108 = arith.mulf %106, %107 : vector<8x128xf32>
      %109 = vector.broadcast %84 : vector<1x128xf32> to vector<8x128xf32>
      %110 = arith.addf %108, %109 : vector<8x128xf32>
      %cst_52 = arith.constant 0.000000e+00 : f32
      %111 = vector.broadcast %cst_52 : f32 to vector<8x128xf32>
      %112 = arith.maximumf %110, %111 : vector<8x128xf32>
      %113 = arith.truncf %112 : vector<8x128xf32> to vector<8x128xbf16>
      %c0_53 = arith.constant 0 : index
      %c0_54 = arith.constant 0 : index
      %114 = vector.load %arg14[%c0_53, %c0_54] : memref<128x128xbf16, #tpu.memory_space<vmem>>, vector<128x128xbf16>
      %cst_55 = arith.constant dense<0.000000e+00> : vector<8x128xf32>
      %115 = tpu.matmul %113, %114, %cst_55 {dimension_numbers = #tpu.dot_dimension_numbers<[1], [0], [0], [1], [0, 0, 1, 1], [], []>} : vector<8x128xbf16>, vector<128x128xbf16>, vector<8x128xf32> -> vector<8x128xf32>
      %c0_56 = arith.constant 0 : index
      %c0_57 = arith.constant 0 : index
      %116 = vector.load %arg15[%c0_56, %c0_57] : memref<1x128xf32, #tpu.memory_space<vmem>>, vector<1x128xf32>
      %c0_58 = arith.constant 0 : index
      %c0_59 = arith.constant 0 : index
      %117 = vector.load %arg16[%c0_58, %c0_59] : memref<1x128xf32, #tpu.memory_space<vmem>>, vector<1x128xf32>
      %118 = vector.broadcast %76 : vector<8x1xf32> to vector<8x128xf32>
      %119 = arith.mulf %115, %118 : vector<8x128xf32>
      %cst_60 = arith.constant dense<0.000000e+00> : vector<128xf32>
      %120 = vector.multi_reduction <add>, %119, %cst_60 [0] : vector<8x128xf32> to vector<128xf32>
      %121 = vector.shape_cast %120 : vector<128xf32> to vector<1x128xf32>
      %cst_61 = arith.constant 5.000000e-01 : f32
      %122 = vector.broadcast %cst_61 : f32 to vector<1x128xf32>
      %123 = arith.mulf %121, %122 : vector<1x128xf32>
      %124 = vector.broadcast %123 : vector<1x128xf32> to vector<8x128xf32>
      %125 = arith.subf %115, %124 : vector<8x128xf32>
      %126 = arith.mulf %125, %125 : vector<8x128xf32>
      %127 = vector.broadcast %76 : vector<8x1xf32> to vector<8x128xf32>
      %128 = arith.mulf %126, %127 : vector<8x128xf32>
      %cst_62 = arith.constant dense<0.000000e+00> : vector<128xf32>
      %129 = vector.multi_reduction <add>, %128, %cst_62 [0] : vector<8x128xf32> to vector<128xf32>
      %130 = vector.shape_cast %129 : vector<128xf32> to vector<1x128xf32>
      %cst_63 = arith.constant 5.000000e-01 : f32
      %131 = vector.broadcast %cst_63 : f32 to vector<1x128xf32>
      %132 = arith.mulf %130, %131 : vector<1x128xf32>
      %133 = vector.broadcast %123 : vector<1x128xf32> to vector<8x128xf32>
      %134 = arith.subf %115, %133 : vector<8x128xf32>
      %cst_64 = arith.constant 9.99999974E-6 : f32
      %135 = vector.broadcast %cst_64 : f32 to vector<1x128xf32>
      %136 = arith.addf %132, %135 : vector<1x128xf32>
      %137 = math.rsqrt %136 : vector<1x128xf32>
      %138 = vector.broadcast %137 : vector<1x128xf32> to vector<8x128xf32>
      %139 = arith.mulf %134, %138 : vector<8x128xf32>
      %140 = vector.broadcast %116 : vector<1x128xf32> to vector<8x128xf32>
      %141 = arith.mulf %139, %140 : vector<8x128xf32>
      %142 = vector.broadcast %117 : vector<1x128xf32> to vector<8x128xf32>
      %143 = arith.addf %141, %142 : vector<8x128xf32>
      %cst_65 = arith.constant 0.000000e+00 : f32
      %144 = vector.broadcast %cst_65 : f32 to vector<8x128xf32>
      %145 = arith.maximumf %143, %144 : vector<8x128xf32>
      %146 = arith.truncf %145 : vector<8x128xf32> to vector<8x128xbf16>
      %c0_66 = arith.constant 0 : index
      %c0_67 = arith.constant 0 : index
      %147 = vector.load %arg17[%c0_66, %c0_67] : memref<128x128xbf16, #tpu.memory_space<vmem>>, vector<128x128xbf16>
      %cst_68 = arith.constant dense<0.000000e+00> : vector<8x128xf32>
      %148 = tpu.matmul %146, %147, %cst_68 {dimension_numbers = #tpu.dot_dimension_numbers<[1], [0], [0], [1], [0, 0, 1, 1], [], []>} : vector<8x128xbf16>, vector<128x128xbf16>, vector<8x128xf32> -> vector<8x128xf32>
      %c0_69 = arith.constant 0 : index
      %c0_70 = arith.constant 0 : index
      %149 = vector.load %arg18[%c0_69, %c0_70] : memref<1x128xf32, #tpu.memory_space<vmem>>, vector<1x128xf32>
      %c0_71 = arith.constant 0 : index
      %c0_72 = arith.constant 0 : index
      %150 = vector.load %arg19[%c0_71, %c0_72] : memref<1x128xf32, #tpu.memory_space<vmem>>, vector<1x128xf32>
      %151 = vector.broadcast %76 : vector<8x1xf32> to vector<8x128xf32>
      %152 = arith.mulf %148, %151 : vector<8x128xf32>
      %cst_73 = arith.constant dense<0.000000e+00> : vector<128xf32>
      %153 = vector.multi_reduction <add>, %152, %cst_73 [0] : vector<8x128xf32> to vector<128xf32>
      %154 = vector.shape_cast %153 : vector<128xf32> to vector<1x128xf32>
      %cst_74 = arith.constant 5.000000e-01 : f32
      %155 = vector.broadcast %cst_74 : f32 to vector<1x128xf32>
      %156 = arith.mulf %154, %155 : vector<1x128xf32>
      %157 = vector.broadcast %156 : vector<1x128xf32> to vector<8x128xf32>
      %158 = arith.subf %148, %157 : vector<8x128xf32>
      %159 = arith.mulf %158, %158 : vector<8x128xf32>
      %160 = vector.broadcast %76 : vector<8x1xf32> to vector<8x128xf32>
      %161 = arith.mulf %159, %160 : vector<8x128xf32>
      %cst_75 = arith.constant dense<0.000000e+00> : vector<128xf32>
      %162 = vector.multi_reduction <add>, %161, %cst_75 [0] : vector<8x128xf32> to vector<128xf32>
      %163 = vector.shape_cast %162 : vector<128xf32> to vector<1x128xf32>
      %cst_76 = arith.constant 5.000000e-01 : f32
      %164 = vector.broadcast %cst_76 : f32 to vector<1x128xf32>
      %165 = arith.mulf %163, %164 : vector<1x128xf32>
      %166 = vector.broadcast %156 : vector<1x128xf32> to vector<8x128xf32>
      %167 = arith.subf %148, %166 : vector<8x128xf32>
      %cst_77 = arith.constant 9.99999974E-6 : f32
      %168 = vector.broadcast %cst_77 : f32 to vector<1x128xf32>
      %169 = arith.addf %165, %168 : vector<1x128xf32>
      %170 = math.rsqrt %169 : vector<1x128xf32>
      %171 = vector.broadcast %170 : vector<1x128xf32> to vector<8x128xf32>
      %172 = arith.mulf %167, %171 : vector<8x128xf32>
      %173 = vector.broadcast %149 : vector<1x128xf32> to vector<8x128xf32>
      %174 = arith.mulf %172, %173 : vector<8x128xf32>
      %175 = vector.broadcast %150 : vector<1x128xf32> to vector<8x128xf32>
      %176 = arith.addf %174, %175 : vector<8x128xf32>
      %177 = arith.truncf %176 : vector<8x128xf32> to vector<8x128xbf16>
      %c0_78 = arith.constant 0 : index
      %c0_79 = arith.constant 0 : index
      %178 = vector.load %arg20[%c0_78, %c0_79] : memref<128x64xbf16, #tpu.memory_space<vmem>>, vector<128x64xbf16>
      %cst_80 = arith.constant dense<0.000000e+00> : vector<8x64xf32>
      %179 = tpu.matmul %177, %178, %cst_80 {dimension_numbers = #tpu.dot_dimension_numbers<[1], [0], [0], [1], [0, 0, 1, 1], [], []>} : vector<8x128xbf16>, vector<128x64xbf16>, vector<8x64xf32> -> vector<8x64xf32>
      %c0_81 = arith.constant 0 : index
      %c0_82 = arith.constant 0 : index
      %180 = vector.load %arg21[%c0_81, %c0_82] : memref<1x64xf32, #tpu.memory_space<vmem>>, vector<1x64xf32>
      %181 = vector.broadcast %180 : vector<1x64xf32> to vector<8x64xf32>
      %182 = arith.addf %179, %181 : vector<8x64xf32>
      %cst_83 = arith.constant 0.000000e+00 : f32
      %183 = vector.broadcast %cst_83 : f32 to vector<8x64xf32>
      %184 = arith.maximumf %182, %183 : vector<8x64xf32>
      %185 = math.absf %182 : vector<8x64xf32>
      %cst_84 = arith.constant 0.000000e+00 : f32
      %186 = vector.broadcast %cst_84 : f32 to vector<8x64xf32>
      %187 = arith.subf %186, %185 : vector<8x64xf32>
      %188 = math.exp %187 : vector<8x64xf32>
      %cst_85 = arith.constant 1.000000e+00 : f32
      %189 = vector.broadcast %cst_85 : f32 to vector<8x64xf32>
      %190 = arith.addf %189, %188 : vector<8x64xf32>
      %191 = math.log %190 : vector<8x64xf32>
      %192 = arith.addf %184, %191 : vector<8x64xf32>
      %193 = arith.truncf %192 : vector<8x64xf32> to vector<8x64xbf16>
      %c0_86 = arith.constant 0 : index
      %c0_87 = arith.constant 0 : index
      %194 = vector.load %arg22[%c0_86, %c0_87] : memref<64x128xbf16, #tpu.memory_space<vmem>>, vector<64x128xbf16>
      %cst_88 = arith.constant dense<0.000000e+00> : vector<8x128xf32>
      %195 = tpu.matmul %193, %194, %cst_88 {dimension_numbers = #tpu.dot_dimension_numbers<[1], [0], [0], [1], [0, 0, 1, 1], [], []>} : vector<8x64xbf16>, vector<64x128xbf16>, vector<8x128xf32> -> vector<8x128xf32>
      %c0_89 = arith.constant 0 : index
      %c0_90 = arith.constant 0 : index
      %196 = vector.load %arg23[%c0_89, %c0_90] : memref<1x128xf32, #tpu.memory_space<vmem>>, vector<1x128xf32>
      %197 = vector.broadcast %196 : vector<1x128xf32> to vector<8x128xf32>
      %198 = arith.addf %195, %197 : vector<8x128xf32>
      %c0_91 = arith.constant 0 : index
      %c0_92 = arith.constant 0 : index
      %199 = vector.load %arg24[%c0_91, %c0_92] : memref<8x128xf32, #tpu.memory_space<vmem>>, vector<8x128xf32>
      tpu.vector_store %arg24[%c0_91, %c0_92], %198 {strides = array<i32>} : memref<8x128xf32, #tpu.memory_space<vmem>>, vector<8x128xf32>,
    } else {
    }
    return
  }
  func.func @transform_0(%arg0: i32) -> (i32, i32) {
    %c0_i32 = arith.constant 0 : i32
    %c0_i32_0 = arith.constant 0 : i32
    %c0_i32_1 = arith.constant 0 : i32
    return %c0_i32, %c0_i32_0 : i32, i32
  }
  func.func @transform_1(%arg0: i32) -> (i32, i32) {
    %c0_i32 = arith.constant 0 : i32
    %c0_i32_0 = arith.constant 0 : i32
    %c0_i32_1 = arith.constant 0 : i32
    return %c0_i32, %c0_i32_0 : i32, i32
  }
  func.func @transform_2(%arg0: i32) -> (i32, i32) {
    %c0_i32 = arith.constant 0 : i32
    %c0_i32_0 = arith.constant 0 : i32
    %c0_i32_1 = arith.constant 0 : i32
    return %c0_i32, %c0_i32_0 : i32, i32
  }
  func.func @transform_3(%arg0: i32) -> (i32, i32, i32) {
    %c0_i32 = arith.constant 0 : i32
    %c0_i32_0 = arith.constant 0 : i32
    %c0_i32_1 = arith.constant 0 : i32
    return %arg0, %c0_i32, %c0_i32_0 : i32, i32, i32
  }
  func.func @transform_4(%arg0: i32) -> (i32, i32, i32) {
    %c0_i32 = arith.constant 0 : i32
    %c0_i32_0 = arith.constant 0 : i32
    %c0_i32_1 = arith.constant 0 : i32
    return %arg0, %c0_i32, %c0_i32_0 : i32, i32, i32
  }
  func.func @transform_5(%arg0: i32) -> (i32, i32, i32) {
    %c0_i32 = arith.constant 0 : i32
    %c0_i32_0 = arith.constant 0 : i32
    %c0_i32_1 = arith.constant 0 : i32
    return %arg0, %c0_i32, %c0_i32_0 : i32, i32, i32
  }
  func.func @transform_6(%arg0: i32) -> (i32, i32, i32) {
    %c0_i32 = arith.constant 0 : i32
    %c0_i32_0 = arith.constant 0 : i32
    %c0_i32_1 = arith.constant 0 : i32
    return %arg0, %c0_i32, %c0_i32_0 : i32, i32, i32
  }
  func.func @transform_7(%arg0: i32) -> (i32, i32, i32) {
    %c0_i32 = arith.constant 0 : i32
    %c0_i32_0 = arith.constant 0 : i32
    %c0_i32_1 = arith.constant 0 : i32
    return %arg0, %c0_i32, %c0_i32_0 : i32, i32, i32
  }
  func.func @transform_8(%arg0: i32) -> (i32, i32, i32) {
    %c0_i32 = arith.constant 0 : i32
    %c0_i32_0 = arith.constant 0 : i32
    %c0_i32_1 = arith.constant 0 : i32
    return %arg0, %c0_i32, %c0_i32_0 : i32, i32, i32
  }
  func.func @transform_9(%arg0: i32) -> (i32, i32, i32) {
    %c0_i32 = arith.constant 0 : i32
    %c0_i32_0 = arith.constant 0 : i32
    %c0_i32_1 = arith.constant 0 : i32
    return %arg0, %c0_i32, %c0_i32_0 : i32, i32, i32
  }
  func.func @transform_10(%arg0: i32) -> (i32, i32) {
    %c0_i32 = arith.constant 0 : i32
    %c0_i32_0 = arith.constant 0 : i32
    %c0_i32_1 = arith.constant 0 : i32
    return %c0_i32, %c0_i32_0 : i32, i32
  }
  func.func @transform_11(%arg0: i32) -> (i32, i32) {
    %c0_i32 = arith.constant 0 : i32
    %c0_i32_0 = arith.constant 0 : i32
    %c0_i32_1 = arith.constant 0 : i32
    return %c0_i32, %c0_i32_0 : i32, i32
  }
  func.func @transform_12(%arg0: i32) -> (i32, i32) {
    %c0_i32 = arith.constant 0 : i32
    %c0_i32_0 = arith.constant 0 : i32
    %c0_i32_1 = arith.constant 0 : i32
    return %c0_i32, %c0_i32_0 : i32, i32
  }
  func.func @transform_13(%arg0: i32) -> (i32, i32) {
    %c0_i32 = arith.constant 0 : i32
    %c0_i32_0 = arith.constant 0 : i32
    %c0_i32_1 = arith.constant 0 : i32
    return %c0_i32, %c0_i32_0 : i32, i32
  }
  func.func @transform_14(%arg0: i32) -> (i32, i32) {
    %c0_i32 = arith.constant 0 : i32
    %c0_i32_0 = arith.constant 0 : i32
    %c0_i32_1 = arith.constant 0 : i32
    return %c0_i32, %c0_i32_0 : i32, i32
  }
  func.func @transform_15(%arg0: i32) -> (i32, i32) {
    %c0_i32 = arith.constant 0 : i32
    %c0_i32_0 = arith.constant 0 : i32
    %c0_i32_1 = arith.constant 0 : i32
    return %c0_i32, %c0_i32_0 : i32, i32
  }
  func.func @transform_16(%arg0: i32) -> (i32, i32) {
    %c0_i32 = arith.constant 0 : i32
    %c0_i32_0 = arith.constant 0 : i32
    %c0_i32_1 = arith.constant 0 : i32
    return %c0_i32, %c0_i32_0 : i32, i32
  }
  func.func @transform_17(%arg0: i32) -> (i32, i32) {
    %c0_i32 = arith.constant 0 : i32
    %c0_i32_0 = arith.constant 0 : i32
    %c0_i32_1 = arith.constant 0 : i32
    return %c0_i32, %c0_i32_0 : i32, i32
  }
  func.func @transform_18(%arg0: i32) -> (i32, i32) {
    %c0_i32 = arith.constant 0 : i32
    %c0_i32_0 = arith.constant 0 : i32
    %c0_i32_1 = arith.constant 0 : i32
    return %c0_i32, %c0_i32_0 : i32, i32
  }
  func.func @transform_19(%arg0: i32) -> (i32, i32) {
    %c0_i32 = arith.constant 0 : i32
    %c0_i32_0 = arith.constant 0 : i32
    %c0_i32_1 = arith.constant 0 : i32
    return %c0_i32, %c0_i32_0 : i32, i32
  }
  func.func @transform_20(%arg0: i32) -> (i32, i32) {
    %c0_i32 = arith.constant 0 : i32
    %c0_i32_0 = arith.constant 0 : i32
    %c0_i32_1 = arith.constant 0 : i32
    return %c0_i32, %c0_i32_0 : i32, i32
  }
  func.func @transform_21(%arg0: i32) -> (i32, i32) {
    %c0_i32 = arith.constant 0 : i32
    %c0_i32_0 = arith.constant 0 : i32
    %c0_i32_1 = arith.constant 0 : i32
    return %c0_i32, %c0_i32_0 : i32, i32
  }
  func.func @transform_22(%arg0: i32) -> (i32, i32) {
    %c0_i32 = arith.constant 0 : i32
    %c0_i32_0 = arith.constant 0 : i32
    %c0_i32_1 = arith.constant 0 : i32
    return %c0_i32, %c0_i32_0 : i32, i32
  }
  func.func @transform_23(%arg0: i32) -> (i32, i32) {
    %c0_i32 = arith.constant 0 : i32
    %c0_i32_0 = arith.constant 0 : i32
    %c0_i32_1 = arith.constant 0 : i32
    return %c0_i32, %c0_i32_0 : i32, i32
  }
}

</mosaic_0001>

<bundles_post_ra>
// kernel: ginet_forward.1
= control target key start
LH: loop header
LB: loop body
LE: loop exit
PB: predicated region body
PF: predicated region fallthrough
CT: control target
= control target key end

     0   :  { %s2863_s0 = inlined_call_operand.vmem [shape: bf16[16,16], index: 0, kind: input, shape index: {}]   ;;  %s2864_s1 = inlined_call_operand.vmem [shape: bf16[16,128], index: 1, kind: input, shape index: {}]   ;;  %s2865_s2 = inlined_call_operand.vmem [shape: bf16[8,16], index: 2, kind: input, shape index: {}]   ;;  %s2866_s3 = inlined_call_operand.vmem [shape: bf16[5,16,128], index: 3, kind: input, shape index: {}]   ;;  %s2867_s4 = inlined_call_operand.vmem [shape: bf16[5,128,256], index: 4, kind: input, shape index: {}]   ;;  %s2868_s5 = inlined_call_operand.vmem [shape: f32[5,1,256], index: 5, kind: input, shape index: {}]   ;;  %s2869_s6 = inlined_call_operand.vmem [shape: bf16[5,256,128], index: 6, kind: input, shape index: {}]   ;;  %s2870_s7 = inlined_call_operand.vmem [shape: f32[5,1,128], index: 7, kind: input, shape index: {}]   ;;  %s2871_s8 = inlined_call_operand.vmem [shape: f32[5,1,128], index: 8, kind: input, shape index: {}]   ;;  %s2872_s9 = inlined_call_operand.vmem [shape: f32[5,1,128], index: 9, kind: input, shape index: {}]   ;;  %s2873_s10 = inlined_call_operand.vmem [shape: bf16[128,128], index: 10, kind: input, shape index: {}]   ;;  %s2874_s11 = inlined_call_operand.vmem [shape: f32[1,128], index: 11, kind: input, shape index: {}]   ;;  %s2875_s12 = inlined_call_operand.vmem [shape: f32[1,128], index: 12, kind: input, shape index: {}]   ;;  %s2876_s13 = inlined_call_operand.vmem [shape: bf16[128,128], index: 13, kind: input, shape index: {}]   ;;  %s2877_s14 = inlined_call_operand.vmem [shape: f32[1,128], index: 14, kind: input, shape index: {}]   ;;  %s2878_s15 = inlined_call_operand.vmem [shape: f32[1,128], index: 15, kind: input, shape index: {}]   ;;  %s2879_s16 = inlined_call_operand.vmem [shape: bf16[128,128], index: 16, kind: input, shape index: {}]   ;;  %s2880_s17 = inlined_call_operand.vmem [shape: f32[1,128], index: 17, kind: input, shape index: {}]   ;;  %s2881_s18 = inlined_call_operand.vmem [shape: f32[1,128], index: 18, kind: input, shape index: {}]   ;;  %s2882_s19 = inlined_call_operand.vmem [shape: bf16[128,64], index: 19, kind: input, shape index: {}]   ;;  %s2883_s20 = inlined_call_operand.vmem [shape: f32[1,64], index: 20, kind: input, shape index: {}]   ;;  %s2884_s21 = inlined_call_operand.vmem [shape: bf16[64,128], index: 21, kind: input, shape index: {}]   ;;  %s2885_s22 = inlined_call_operand.vmem [shape: f32[1,128], index: 22, kind: input, shape index: {}]   ;;  %s2886_s23 = inlined_call_operand.vmem [shape: f32[8,128], index: 23, kind: output, shape index: {}]  }
   0x1   :  { %2890 = sst [smem:[#allocation4_spill]] %s2863_s0 }
   0x2   :  { %2891 = sst [smem:[#allocation5_spill]] %s2864_s1 }
   0x3   :  { %2892 = sst [smem:[#allocation6_spill]] %s2865_s2 }
   0x4   :  { %2893 = sst [smem:[#allocation7_spill]] %s2866_s3 }
   0x5   :  { %2894 = sst [smem:[#allocation8_spill]] %s2867_s4  ;;  %s2551_s4 = smov 0  }
   0x6   :  { %2895 = sst [smem:[#allocation9_spill]] %s2868_s5 }
   0x7   :  { %2896 = sst [smem:[#allocation10_spill]] %s2869_s6 }
   0x8   :  { %2897 = sst [smem:[#allocation11_spill]] %s2870_s7 }
   0x9   :  { %2898 = sst [smem:[#allocation12_spill]] %s2877_s14 }
   0xa   :  { %2899 = sst [smem:[#allocation13_spill]] %s2878_s15 }
   0xb   :  { %2900 = sst [smem:[#allocation14_spill]] %s2880_s17 }
   0xc   :  { %2901 = sst [smem:[#allocation15_spill]] %s2881_s18 }
   0xd   :  { %2902 = sst [smem:[#allocation16_spill]] %s2882_s19 }
   0xe   :  { %2903 = sst [smem:[#allocation17_spill]] %s2883_s20 }
   0xf   :  { %2904 = sst [smem:[#allocation18_spill]] %s2884_s21 }
  0x10   :  { %2905 = sst [smem:[#allocation19_spill]] %s2885_s22 }
  0x11   :  { %2906 = sst [smem:[#allocation20_spill]] %s2886_s23 }
  0x12 LB: > { %2907 = sst [smem:[#allocation3_spill]] %s2424_s4  ;;  %s2557_s30 = sadd.s32 4294967295, %s2424_s4   ;;  %s2424_s4 = sphi %s2551_s4, %s33_s4  }
  0x13   : > { %p2040_p0 = scmp.ge.s32.totalorder %s2424_s4, 1  ;;  %p685_p1 = scmp.lt.s32.totalorder %s2424_s4, 6 }
  0x15   : > { %p686_p2 = pnand %p2040_p0, %p685_p1 }
  0x16   : > { %p767_p3 = scmp.lt.s32.totalorder (!%p686_p2), %s2557_s30, 4  ;;  %s2908_s2 = sld [smem:[#allocation7_spill]] (!%p686_p2) }
  0x17   : > { %689 = sbr.rel (%p686_p2) target bundleno = 2262 (0x8d6), region = 112  ;;  %s2909_s28 = sld [smem:[#allocation8_spill]] (!%p686_p2) }
  0x18   : > { %s2910_s23 = sld [smem:[#allocation10_spill]] (!%p686_p2)  ;;  %s2911_s18 = sld [smem:[#allocation9_spill]] (!%p686_p2) }
  0x19   : > { %p2048_p4 = scmp.ne.s32.totalorder (!%p686_p2), %s2557_s30, 0 }
  0x1e   : > { %s2563_s24 = scalar_select %p767_p3, %s2557_s30, 4 }
  0x1f   : > { %s2913_s20 = sld [smem:[#allocation5_spill]] (!%p2048_p4) }
  0x20   : > { %s2137_s25 = sshll.u32 %s2563_s24, 3  ;;  %s2138_s5 = sshll.u32 %s2563_s24, 7 }
  0x21   : > { %s2570_s6 = scalar_lea.vmem %s2908_s2, %s2137_s25  ;;  %s2575_s29 = scalar_lea.vmem %s2909_s28, %s2138_s5 }
  0x22   : > { %s2045_s3 = sshll.u32 %s2563_s24, 1  ;;  %s2581_s22 = scalar_lea.vmem %s2910_s23, %s2138_s5 }
  0x23   : > { %s2586_s17 = scalar_lea.vmem %s2911_s18, %s2045_s3  ;;  %s2912_s25 = sld [smem:[#allocation11_spill]] }
  0x24   : > { %s791_s27 = scalar_lea.vmem %s2871_s8, %s2563_s24  ;;  %s794_s14 = scalar_lea.vmem %s2872_s9, %s2563_s24 }
  0x25   : > { %799 = sbr.rel (%p2048_p4) target bundleno = 44 (0x2c), region = 116  ;;  %v2328_v0 = vld [vmem:[%s2913_s20] sm:$0xff] (!%p2048_p4)  }
  0x26   : > { %808 = vst [vmem:[#allocation2] sm:$0xff] (!%p2048_p4), %v2328_v0 }
  0x29   : > { %s788_s26 = scalar_lea.vmem %s2912_s25, %s2563_s24 }
  0x2c PF: > { %s2914_s21 = sld [smem:[#allocation4_spill]]  ;;  %v2426_v3 = vmov 0.0   ;;  %vm2427_vm0 = vmmov 0   ;;  %vm830_vm1 = vcmask 130048   ;;  %v2330_v4 = vld [vmem:[%s2575_s29 + $0x4] ss:$8 sps:$4 sm:$0xff]   ;;  %v809_v47 = vlaneseq }
  0x2d   : > { %v818_v1 = vld [vmem:[#allocation2] sm:$0xff]  ;;  %2211 = vmatprep.subr.bf16.mxu0 %v2426_v3  ;;  %2213 = vmatprep.mubr.msk.bf16.mxu0 %vm2427_vm0, %v2426_v3  ;;  %v2333_v6 = vld [vmem:[%s2575_s29 + $0x14] ss:$8 sps:$4 sm:$0xff]   ;;  %v2335_v7 = vld [vmem:[%s2575_s29 + $0x10] ss:$8 sps:$4 sm:$0xff]   ;;  %v2428_v20 = vmov 0  }
  0x2e   : > { %2212 = vmatpush3.bf16.msra.mxu0 %v818_v1  ;;  %v2332_v5 = vld [vmem:[%s2575_s29] ss:$8 sps:$4 sm:$0xff]   ;;  %984 = vmatprep.subr.bf16.mxu1 %v2330_v4  ;;  %v2336_v8 = vld [vmem:[%s2575_s29 + $0x24] ss:$8 sps:$4 sm:$0xff]   ;;  %v2339_v10 = vld [vmem:[%s2575_s29 + $0x34] ss:$8 sps:$4 sm:$0xff]  }
  0x2f   : > { %985 = vmatpush1.bf16.msra.mxu1 %v2332_v5  ;;  %v2338_v9 = vld [vmem:[%s2575_s29 + $0x20] ss:$8 sps:$4 sm:$0xff]   ;;  %v2341_v11 = vld [vmem:[%s2575_s29 + $0x30] ss:$8 sps:$4 sm:$0xff]   ;;  %v2342_v12 = vld [vmem:[%s2575_s29 + $0x44] ss:$8 sps:$4 sm:$0xff]   ;;  %1016 = vmatprep.mubr.bf16.mxu1 %v2428_v20 }
  0x30   : > { %986 = vmatprep.subr.bf16.mxu1 %v2333_v6  ;;  %v2344_v13 = vld [vmem:[%s2575_s29 + $0x40] ss:$8 sps:$4 sm:$0xff]   ;;  %v2345_v14 = vld [vmem:[%s2575_s29 + $0x54] ss:$8 sps:$4 sm:$0xff]   ;;  %v2347_v15 = vld [vmem:[%s2575_s29 + $0x50] ss:$8 sps:$4 sm:$0xff]  }
  0x31   : > { %v2348_v16 = vld [vmem:[%s2575_s29 + $0x64] ss:$8 sps:$4 sm:$0xff]   ;;  %v2350_v17 = vld [vmem:[%s2575_s29 + $0x60] ss:$8 sps:$4 sm:$0xff]   ;;  %v2351_v18 = vld [vmem:[%s2575_s29 + $0x74] ss:$8 sps:$4 sm:$0xff]  }
  0x32   : > { %v2329_v2 = vld [vmem:[%s2914_s21] sm:$0xff]   ;;  %v2353_v19 = vld [vmem:[%s2575_s29 + $0x70] ss:$8 sps:$4 sm:$0xff]   ;;  %v2356_v23 = vld [vmem:[%s2581_s22 + $0x48] sm:$0xff]   ;;  %v2641_v48 = vshrl.u32 %v809_v47, 7  ;;  %p2087_p5 = scmp.ne.s32.totalorder %s2557_s30, 4 }
  0x33   : > { %2214 = vmatmul.mubr.msk.bf16.vlgmr.msra.gmra.mrb[0].mxu0 %vm830_vm1, %v2329_v2  ;;  %987 = vmatpush1.bf16.msra.mxu1 %v2335_v7  ;;  %v2354_v21 = vld [vmem:[%s2581_s22 + $0x40] sm:$0xff]   ;;  %v2357_v24 = vld [vmem:[%s2581_s22 + $0x8] sm:$0xff]   ;;  %v2358_v25 = vld [vmem:[%s2581_s22 + $0x50] sm:$0xff]   ;;  %vm2430_vm2 = vmmov (!%p2087_p5), 0   ;;  %s2916_s25 = sld [smem:[#allocation6_spill]] (!%p2087_p5)  ;;  %s2917_s7 = sld [smem:[#allocation12_spill]] (!%p2087_p5) }
  0x34   : > { %988 = vmatprep.subr.bf16.mxu1 %v2336_v8  ;;  %v2355_v22 = vld [vmem:[%s2581_s22] sm:$0xff]   ;;  %2146 = vmatprep.subr.bf16.mxu0 %v2354_v21  ;;  %v2359_v26 = vld [vmem:[%s2581_s22 + $0x10] sm:$0xff]   ;;  %v2360_v27 = vld [vmem:[%s2581_s22 + $0x58] sm:$0xff]   ;;  %v896_v49 = vsub.s32 0, %v2641_v48  ;;  %v900_v51 = vsub.s32 1, %v2641_v48  ;;  %vm1265_vm3 = vcmp.lt.s32.totalorder (!%p2087_p5), %v2641_v48, 2 }
  0x35   : > { %2147 = vmatpush3.bf16.msra.mxu0 %v2355_v22  ;;  %v2361_v28 = vld [vmem:[%s2581_s22 + $0x18] sm:$0xff]   ;;  %v2362_v29 = vld [vmem:[%s2581_s22 + $0x60] sm:$0xff]   ;;  %v2364_v31 = vld [vmem:[%s2581_s22 + $0x68] sm:$0xff]   ;;  %s2918_s4 = sld [smem:[#allocation13_spill]] (!%p2087_p5)  ;;  %s2919_s19 = sld [smem:[#allocation16_spill]] (!%p2087_p5)  ;;  %vm1901_vm4 = vcmask (!%p2087_p5), 523264  }
  0x36   : > { %2148 = vmatprep.subr.bf16.mxu0 %v2356_v23  ;;  %v2363_v30 = vld [vmem:[%s2581_s22 + $0x20] sm:$0xff]   ;;  %v2365_v42 = vld [vmem:[%s2581_s22 + $0x28] sm:$0xff]   ;;  %v2366_v43 = vld [vmem:[%s2581_s22 + $0x70] sm:$0xff]   ;;  %s2921_s23 = sld [smem:[#allocation15_spill]] (!%p2087_p5)  ;;  %s2922_s18 = sld [smem:[#allocation18_spill]] (!%p2087_p5) }
  0x37   : > { %989 = vmatpush1.bf16.msra.mxu1 %v2338_v9  ;;  %v2141_v32 = vld [vmem:[%s2570_s6] sm:$0xff]   ;;  %v2367_v44 = vld [vmem:[%s2581_s22 + $0x30] sm:$0xff]   ;;  %v2368_v45 = vld [vmem:[%s2581_s22 + $0x78] sm:$0xff]   ;;  %s2923_s24 = sld [smem:[#allocation17_spill]] (!%p2087_p5)  ;;  %s2924_s1 = sld [smem:[#allocation19_spill]] (!%p2087_p5) }
  0x38   : > { %990 = vmatprep.subr.bf16.mxu1 %v2339_v10  ;;  %v2142_v33 = vunpack.c.l.bf16 %v2141_v32  ;;  %v2143_v34 = vunpack.c.h.bf16 %v2141_v32  ;;  %v2369_v46 = vld [vmem:[%s2581_s22 + $0x38] sm:$0xff]   ;;  %v892_v50 = vld [vmem:[%s2586_s17] sm:$0x3] }
  0x39   : > { %2149 = vmatpush3.bf16.msra.mxu0 %v2357_v24  ;;  %v897_v52 = vrot.slane %v892_v50, %v896_v49  ;;  %v901_v53 = vrot.slane %v892_v50, %v900_v51  ;;  %v2068_v8 = vld [vmem:[%s788_s26] ss:$0 sm:$0xff]  ;;  %v2373_v50 = vld [vmem:[%s2873_s10 + $0x8] sm:$0xff] (!%p2087_p5)   ;;  %v2374_v51 = vld [vmem:[%s2873_s10 + $0x10] sm:$0xff] (!%p2087_p5)   ;;  %s2925_s26 = sld [smem:[#allocation20_spill]] (!%p2087_p5) }
  0x3a   : > { %2150 = vmatprep.subr.bf16.mxu0 %v2358_v25  ;;  %v2372_v47 = vld [vmem:[%s2873_s10] sm:$0xff] (!%p2087_p5)  }
  0x3b   : > { %991 = vmatpush1.bf16.msra.mxu1 %v2341_v11  ;;  %v1268_v49 = vld [vmem:[%s2916_s25] sm:$0xf] (!%p2087_p5) }
  0x3c   : > { %992 = vmatprep.subr.bf16.mxu1 %v2342_v12 }
  0x3d   : > { %2151 = vmatpush3.bf16.msra.mxu0 %v2359_v26 }
  0x3e   : > { %2152 = vmatprep.subr.bf16.mxu0 %v2360_v27 }
  0x3f   : > { %993 = vmatpush1.bf16.msra.mxu1 %v2344_v13 }
  0x40   : > { %994 = vmatprep.subr.bf16.mxu1 %v2345_v14 }
  0x41   : > { %2153 = vmatpush3.bf16.msra.mxu0 %v2361_v28 }
  0x42   : > { %2154 = vmatprep.subr.bf16.mxu0 %v2362_v29 }
  0x43   : > { %995 = vmatpush1.bf16.msra.mxu1 %v2347_v15 }
  0x44   : > { %996 = vmatprep.subr.bf16.mxu1 %v2348_v16 }
  0x45   : > { %2155 = vmatpush3.bf16.msra.mxu0 %v2363_v30 }
  0x46   : > { %2156 = vmatprep.subr.bf16.mxu0 %v2364_v31 }
  0x47   : > { %997 = vmatpush1.bf16.msra.mxu1 %v2350_v17 }
  0x48   : > { %998 = vmatprep.subr.bf16.mxu1 %v2351_v18 }
  0x49   : > { %2157 = vmatpush3.bf16.msra.mxu0 %v2365_v42 }
  0x4a   : > { %2158 = vmatprep.subr.bf16.mxu0 %v2366_v43 }
  0x4b   : > { %999 = vmatpush1.bf16.msra.mxu1 %v2353_v19 }
  0x4d   : > { %2159 = vmatpush3.bf16.msra.mxu0 %v2367_v44 }
  0x4e   : > { %2160 = vmatprep.subr.bf16.mxu0 %v2368_v45 }
  0x51   : > { %2161 = vmatpush3.bf16.msra.mxu0 %v2369_v46  ;;  %v2429_v46 = vmov (!%p2087_p5), 0.0  }
  0x52   : > { %2217 = vmatprep.subr.bf16.mxu0 (!%p2087_p5), %v2429_v46  ;;  %2223 = vmatprep.subr.bf16.mxu1 (!%p2087_p5), %v2429_v46 }
 0x106   : > { %v868_v35 = vpop.f32.mrb[0].mxu0 }
 0x107   : > { %v2215_v36 = vpop.f32.mrb[1].mxu0  ;;  %v869_v38 = vadd.f32 %v2142_v33, %v868_v35  ;;  %v2085_v35 = vld [vmem:[%s791_s27] ss:$0 sm:$0xff]  ;;  %s2920_s27 = sld [smem:[#allocation14_spill]] (!%p2087_p5) }
 0x108   : > { %v871_v37 = vpop.f32.mrb[2].mxu0 }
 0x109   : > { %v872_v39 = vadd.f32 %v2143_v34, %v871_v37  ;;  %v2216_v40 = vpop.f32.mrb[3].mxu0 }
 0x10b   : > { %v875_v41 = vpack.c.bf16 %v872_v39, %v869_v38  ;;  %v2086_v38 = vld [vmem:[%s794_s14] ss:$0 sm:$0xff] }
 0x10d   : > { %1017 = vmatmul.mubr.bf16.vlgmr.msra.gmra.mrb[0].mxu1 %v875_v41 }
 0x10e   : > { %2224 = vmatpush3.bf16.msra.mxu1 (!%p2087_p5), %v2372_v47  ;;  %2239 = vmatprep.mubr.msk.bf16.mxu1 (!%p2087_p5), %vm2430_vm2, %v2429_v46 }
 0x10f   : > { %2225 = vmatprep.subr.bf16.mxu1 (!%p2087_p5), %v2429_v46 }
 0x112   : > { %2226 = vmatpush3.bf16.msra.mxu1 (!%p2087_p5), %v2373_v50 }
 0x113   : > { %2227 = vmatprep.subr.bf16.mxu1 (!%p2087_p5), %v2429_v46 }
 0x116   : > { %2228 = vmatpush3.bf16.msra.mxu1 (!%p2087_p5), %v2374_v51 }
 0x117   : > { %2229 = vmatprep.subr.bf16.mxu1 (!%p2087_p5), %v2429_v46 }
 0x1e0   : > { %v1018_v54 = vpop.f32.mrb[0].mxu1 }
 0x1e1   : > { %v1019_v55 = vadd.f32 %v1018_v54, %v897_v52  ;;  %v1020_v56 = vpop.f32.mrb[1].mxu1  ;;  %v2377_v54 = vld [vmem:[%s2873_s10 + $0x28] sm:$0xff] (!%p2087_p5)  }
 0x1e2   : > { %v1021_v57 = vadd.f32 %v1020_v56, %v901_v53  ;;  %v1022_v58 = vpop.f32.mrb[2].mxu1  ;;  %v2379_v56 = vld [vmem:[%s2873_s10 + $0x38] sm:$0xff] (!%p2087_p5)  }
 0x1e3   : > { %v1023_v59 = vadd.f32 %v1022_v58, %v897_v52  ;;  %v1024_v60 = vpop.f32.mrb[3].mxu1  ;;  %v1027_v62 = vmax.f32 %v1019_v55, 0.0  ;;  %v2375_v52 = vld [vmem:[%s2873_s10 + $0x18] sm:$0xff] (!%p2087_p5)   ;;  %v2378_v55 = vld [vmem:[%s2873_s10 + $0x30] sm:$0xff] (!%p2087_p5)  }
 0x1e4   : > { %v1025_v61 = vadd.f32 %v1024_v60, %v901_v53  ;;  %v1028_v0 = vmax.f32 %v1021_v57, 0.0  ;;  %v2376_v53 = vld [vmem:[%s2873_s10 + $0x20] sm:$0xff] (!%p2087_p5)   ;;  %2230 = vmatpush3.bf16.msra.mxu1 (!%p2087_p5), %v2375_v52 }
 0x1e5   : > { %v1029_v63 = vmax.f32 %v1023_v59, 0.0  ;;  %2231 = vmatprep.subr.bf16.mxu1 (!%p2087_p5), %v2429_v46 }
 0x1e6   : > { %v1030_v1 = vmax.f32 %v1025_v61, 0.0 }
 0x1e7   : > { %v1031_v2 = vpack.c.bf16 %v1029_v63, %v1027_v62  ;;  %v2380_v62 = vld [vmem:[%s2876_s13] sm:$0xff] (!%p2087_p5)   ;;  %v2381_v63 = vld [vmem:[%s2876_s13 + $0x8] sm:$0xff] (!%p2087_p5)  }
 0x1e8   : > { %v1032_v3 = vpack.c.bf16 %v1030_v1, %v1028_v0  ;;  %2232 = vmatpush3.bf16.msra.mxu1 (!%p2087_p5), %v2376_v53  ;;  %v2382_v0 = vld [vmem:[%s2876_s13 + $0x10] sm:$0xff] (!%p2087_p5)   ;;  %v2383_v1 = vld [vmem:[%s2876_s13 + $0x18] sm:$0xff] (!%p2087_p5)  }
 0x1e9   : > { %2233 = vmatprep.subr.bf16.mxu1 (!%p2087_p5), %v2429_v46 }
 0x1ea   : > { %1200 = vmatprep.mubr.bf16.mxu0 %v1032_v3  ;;  %v2385_v3 = vld [vmem:[%s2876_s13 + $0x28] sm:$0xff] (!%p2087_p5)  }
 0x1eb   : > { %1201 = vmatmul.mubr.bf16.vlgmr.msra.gmra.mrb[4].mxu0 %v1031_v2  ;;  %v2384_v2 = vld [vmem:[%s2876_s13 + $0x20] sm:$0xff] (!%p2087_p5)  }
 0x1ec   : > { %2219 = vmatprep.mubr.msk.bf16.mxu0 (!%p2087_p5), %vm2430_vm2, %v2429_v46  ;;  %2234 = vmatpush3.bf16.msra.mxu1 (!%p2087_p5), %v2377_v54 }
 0x1ed   : > { %2235 = vmatprep.subr.bf16.mxu1 (!%p2087_p5), %v2429_v46 }
 0x1f0   : > { %2236 = vmatpush3.bf16.msra.mxu1 (!%p2087_p5), %v2378_v55 }
 0x1f1   : > { %2237 = vmatprep.subr.bf16.mxu1 (!%p2087_p5), %v2429_v46 }
 0x1f4   : > { %2238 = vmatpush3.bf16.msra.mxu1 (!%p2087_p5), %v2379_v56 }
 0x1f5   : > { %2263 = vmatprep.subr.bf16.mxu1 (!%p2087_p5), %v2429_v46 }
 0x2be   : > { %v2162_v4 = vpop.f32.mrb[4].mxu0 }
 0x2bf   : > { %v2163_v5 = vpop.f32.mrb[5].mxu0 }
 0x2c0   : > { %v2164_v6 = vadd.f32 %v2163_v5, %v2162_v4  ;;  %v2165_v7 = vpop.f32.mrb[6].mxu0  ;;  %v2386_v4 = vld [vmem:[%s2876_s13 + $0x30] sm:$0xff] (!%p2087_p5)   ;;  %v2387_v5 = vld [vmem:[%s2876_s13 + $0x38] sm:$0xff] (!%p2087_p5)  }
 0x2c1   : > { %v2166_v9 = vpop.f32.mrb[7].mxu0 }
 0x2c2   : > { %v2167_v10 = vadd.f32 %v2166_v9, %v2165_v7  ;;  %v1203_v11 = vadd.f32 %v2164_v6, %v2068_v8  ;;  %v2743_v6 = vsel (!%p2087_p5), %vm1265_vm3, 1.0, %v2429_v46 }
 0x2c4   : > { %v1206_v12 = vadd.f32 %v2167_v10, %v2068_v8 }
 0x2c6   : > { %v1213_v13 = vadd.f32 %v1206_v12, %v1203_v11 }
 0x2c8   : > { %v1214_v14 = vrot.slane %v1213_v13, 4 }
 0x2ca   : > { %v1215_v15 = vadd.f32 %v1214_v14, %v1213_v13 }
 0x2cc   : > { %v1216_v16 = vrot.slane %v1215_v15, 2 }
 0x2ce   : > { %v1217_v17 = vadd.f32 %v1216_v16, %v1215_v15 }
 0x2d0   : > { %v1218_v18 = vrot.slane %v1217_v17, 1 }
 0x2d2   : > { %v1219_v19 = vadd.f32 %v1218_v18, %v1217_v17 }
 0x2d4   : > { %v1220_v20 = vmul.f32 0.0625, %v1219_v19 }
 0x2d6   : > { %v1221_v21 = vsub.f32 %v1203_v11, %v1220_v20  ;;  %v1222_v22 = vsub.f32 %v1206_v12, %v1220_v20 }
 0x2d8   : > { %v1223_v23 = vmul.f32 %v1221_v21, %v1221_v21  ;;  %v1224_v24 = vmul.f32 %v1222_v22, %v1222_v22 }
 0x2da   : > { %v1227_v25 = vadd.f32 %v1224_v24, %v1223_v23 }
 0x2dc   : > { %v1228_v26 = vrot.slane %v1227_v25, 4 }
 0x2de   : > { %v1229_v27 = vadd.f32 %v1228_v26, %v1227_v25 }
 0x2e0   : > { %v1230_v28 = vrot.slane %v1229_v27, 2 }
 0x2e2   : > { %v1231_v29 = vadd.f32 %v1230_v28, %v1229_v27 }
 0x2e4   : > { %v1232_v30 = vrot.slane %v1231_v29, 1 }
 0x2e6   : > { %v1233_v31 = vadd.f32 %v1232_v30, %v1231_v29  ;;  %v2098_v30 = vld [vmem:[%s2874_s11] ss:$0 sm:$0xff] (!%p2087_p5) }
 0x2e8   : > { %v1234_v32 = vmul.f32 0.0625, %v1233_v31 }
 0x2ea   : > { %v1235_v33 = vadd.f32 1e-05, %v1234_v32  ;;  %v2099_v32 = vld [vmem:[%s2875_s12] ss:$0 sm:$0xff] (!%p2087_p5) }
 0x2ec   : > { %2370 = vrsqrt.f32 %v1235_v33 }
 0x2f6   : > { %v2371_v34 = vpop.eup %2370 }
 0x2f7   : > { %v1237_v36 = vmul.f32 %v2371_v34, %v1221_v21  ;;  %v1238_v37 = vmul.f32 %v2371_v34, %v1222_v22 }
 0x2f9   : > { %v1245_v39 = vmul.f32 %v2085_v35, %v1237_v36  ;;  %v1246_v40 = vmul.f32 %v2085_v35, %v1238_v37  ;;  %v2388_v37 = vld [vmem:[%s2879_s16] sm:$0xff] (!%p2087_p5)  }
 0x2fb   : > { %v1253_v41 = vadd.f32 %v2086_v38, %v1245_v39  ;;  %v1254_v42 = vadd.f32 %v2086_v38, %v1246_v40  ;;  %1264 = sbr.rel (%p2087_p5) target bundleno = 2262 (0x8d6), region = 120  ;;  %v2389_v38 = vld [vmem:[%s2879_s16 + $0x8] sm:$0xff] (!%p2087_p5)   ;;  %v2390_v39 = vld [vmem:[%s2879_s16 + $0x10] sm:$0xff] (!%p2087_p5)   ;;  %v2391_v40 = vld [vmem:[%s2879_s16 + $0x18] sm:$0xff] (!%p2087_p5)  }
 0x2fd   : > { %v1255_v43 = vmax.f32 %v1253_v41, 0.0  ;;  %v1256_v44 = vmax.f32 %v1254_v42, 0.0  ;;  %v2392_v41 = vld [vmem:[%s2879_s16 + $0x20] sm:$0xff] (!%p2087_p5)   ;;  %v2393_v42 = vld [vmem:[%s2879_s16 + $0x28] sm:$0xff] (!%p2087_p5)  }
 0x2ff   : > { %v1259_v45 = vpack.c.bf16 %v1256_v44, %v1255_v43  ;;  %v2394_v43 = vld [vmem:[%s2879_s16 + $0x30] sm:$0xff] (!%p2087_p5)   ;;  %v2395_v44 = vld [vmem:[%s2879_s16 + $0x38] sm:$0xff] (!%p2087_p5)  }
 0x301   : > { %1260 = vst [vmem:[#allocation2] sm:$0xff] %v1259_v45  ;;  %2218 = vmatpush3.bf16.msra.mxu0 (!%p2087_p5), %v1259_v45 }
 0x302   : > { %2243 = vmatprep.subr.bf16.mxu0 %v2429_v46 }
 0x304   : > { %2220 = vmatmul.mubr.msk.bf16.vlgmr.msra.gmra.mrb[0].mxu0 %vm830_vm1, %v1268_v49 }
 0x305   : > { %2259 = vmatprep.mubr.msk.bf16.mxu0 %vm2430_vm2, %v2429_v46  ;;  %2244 = vmatpush3.bf16.msra.mxu0 %v2380_v62 }
 0x306   : > { %2245 = vmatprep.subr.bf16.mxu0 %v2429_v46 }
 0x309   : > { %2246 = vmatpush3.bf16.msra.mxu0 %v2381_v63 }
 0x30a   : > { %2247 = vmatprep.subr.bf16.mxu0 %v2429_v46 }
 0x30d   : > { %2248 = vmatpush3.bf16.msra.mxu0 %v2382_v0 }
 0x30e   : > { %2249 = vmatprep.subr.bf16.mxu0 %v2429_v46 }
 0x311   : > { %2250 = vmatpush3.bf16.msra.mxu0 %v2383_v1 }
 0x312   : > { %2251 = vmatprep.subr.bf16.mxu0 %v2429_v46 }
 0x315   : > { %2252 = vmatpush3.bf16.msra.mxu0 %v2384_v2 }
 0x316   : > { %2253 = vmatprep.subr.bf16.mxu0 %v2429_v46 }
 0x319   : > { %2254 = vmatpush3.bf16.msra.mxu0 %v2385_v3 }
 0x31a   : > { %2255 = vmatprep.subr.bf16.mxu0 %v2429_v46 }
 0x31d   : > { %2256 = vmatpush3.bf16.msra.mxu0 %v2386_v4 }
 0x31e   : > { %2257 = vmatprep.subr.bf16.mxu0 %v2429_v46 }
 0x321   : > { %2258 = vmatpush3.bf16.msra.mxu0 %v2387_v5 }
 0x322   : > { %2283 = vmatprep.subr.bf16.mxu0 %v2429_v46 }
 0x3d7   : > { %v1306_v57 = vpop.f32.mrb[0].mxu0 }
 0x3d8   : > { %v1312_v58 = vpack.c.bf16 %v1306_v57, %v1306_v57  ;;  %v2221_v59 = vpop.f32.mrb[1].mxu0 }
 0x3d9   : > { %v1309_v60 = vpop.f32.mrb[2].mxu0 }
 0x3da   : > { %v2222_v61 = vpop.f32.mrb[3].mxu0  ;;  %2240 = vmatmul.mubr.bf16.vlgmr.msra.gmra.mrb[0].mxu1 %v1312_v58 }
 0x3db   : > { %2279 = vmatprep.mubr.msk.bf16.mxu1 %vm2430_vm2, %v2429_v46  ;;  %2264 = vmatpush3.bf16.msra.mxu1 %v2388_v37 }
 0x3dc   : > { %2265 = vmatprep.subr.bf16.mxu1 %v2429_v46 }
 0x3df   : > { %2266 = vmatpush3.bf16.msra.mxu1 %v2389_v38 }
 0x3e0   : > { %2267 = vmatprep.subr.bf16.mxu1 %v2429_v46 }
 0x3e3   : > { %2268 = vmatpush3.bf16.msra.mxu1 %v2390_v39 }
 0x3e4   : > { %2269 = vmatprep.subr.bf16.mxu1 %v2429_v46 }
 0x3e7   : > { %2270 = vmatpush3.bf16.msra.mxu1 %v2391_v40 }
 0x3e8   : > { %2271 = vmatprep.subr.bf16.mxu1 %v2429_v46 }
 0x3eb   : > { %2272 = vmatpush3.bf16.msra.mxu1 %v2392_v41 }
 0x3ec   : > { %2273 = vmatprep.subr.bf16.mxu1 %v2429_v46 }
 0x3ef   : > { %2274 = vmatpush3.bf16.msra.mxu1 %v2393_v42 }
 0x3f0   : > { %2275 = vmatprep.subr.bf16.mxu1 %v2429_v46 }
 0x3f3   : > { %2276 = vmatpush3.bf16.msra.mxu1 %v2394_v43 }
 0x3f4   : > { %2277 = vmatprep.subr.bf16.mxu1 %v2429_v46 }
 0x3f7   : > { %2278 = vmatpush3.bf16.msra.mxu1 %v2395_v44 }
 0x3f8   : > { %2303 = vmatprep.subr.bf16.mxu1 %v2429_v46 }
 0x4ad   : > { %v1411_v7 = vpop.f32.mrb[0].mxu1 }
 0x4ae   : > { %v1419_v8 = vmul.f32 %v2743_v6, %v1411_v7  ;;  %v2241_v9 = vpop.f32.mrb[1].mxu1 }
 0x4af   : > { %v1414_v10 = vpop.f32.mrb[2].mxu1 }
 0x4b0   : > { %v1420_v11 = vrot.slane %v1419_v8, 4  ;;  %v2242_v12 = vpop.f32.mrb[3].mxu1  ;;  %v2109_v10 = vld [vmem:[%s2918_s4] ss:$0 sm:$0xff] }
 0x4b2   : > { %v1421_v13 = vadd.f32 %v1420_v11, %v1419_v8  ;;  %v2108_v8 = vld [vmem:[%s2917_s7] ss:$0 sm:$0xff] }
 0x4b4   : > { %v1422_v14 = vrot.slane %v1421_v13, 2 }
 0x4b6   : > { %v1423_v15 = vadd.f32 %v1422_v14, %v1421_v13 }
 0x4b8   : > { %v1424_v16 = vrot.slane %v1423_v15, 1 }
 0x4ba   : > { %v1425_v17 = vadd.f32 %v1424_v16, %v1423_v15  ;;  %v2396_v15 = vld [vmem:[%s2919_s19] sm:$0xff]   ;;  %v2397_v16 = vld [vmem:[%s2919_s19 + $0x8] sm:$0xff]  }
 0x4bc   : > { %v1426_v18 = vmul.f32 0.5, %v1425_v17  ;;  %v2398_v17 = vld [vmem:[%s2919_s19 + $0x10] sm:$0xff]  }
 0x4be   : > { %v1427_v19 = vsub.f32 %v1411_v7, %v1426_v18  ;;  %v2399_v18 = vld [vmem:[%s2919_s19 + $0x18] sm:$0xff]  }
 0x4c0   : > { %v1428_v20 = vmul.f32 %v1427_v19, %v1427_v19 }
 0x4c2   : > { %v1429_v48 = vmul.f32 %v2743_v6, %v1428_v20  ;;  %v2401_v20 = vld [vmem:[%s2919_s19 + $0x28] sm:$0xff]  }
 0x4c4   : > { %v1430_v21 = vrot.slane %v1429_v48, 4 }
 0x4c6   : > { %v1431_v22 = vadd.f32 %v1430_v21, %v1429_v48  ;;  %v2402_v48 = vld [vmem:[%s2919_s19 + $0x30] sm:$0xff]   ;;  %v2403_v21 = vld [vmem:[%s2919_s19 + $0x38] sm:$0xff]  }
 0x4c8   : > { %v1432_v23 = vrot.slane %v1431_v22, 2 }
 0x4ca   : > { %v1433_v24 = vadd.f32 %v1432_v23, %v1431_v22 }
 0x4cc   : > { %v1434_v25 = vrot.slane %v1433_v24, 1 }
 0x4ce   : > { %v1435_v26 = vadd.f32 %v1434_v25, %v1433_v24 }
 0x4d0   : > { %v1436_v27 = vmul.f32 0.5, %v1435_v26 }
 0x4d2   : > { %v1437_v28 = vadd.f32 1e-05, %v1436_v27 }
 0x4d4   : > { %2408 = vrsqrt.f32 %v1437_v28 }
 0x4de   : > { %v2409_v29 = vpop.eup %2408 }
 0x4df   : > { %v1439_v31 = vmul.f32 %v2409_v29, %v1427_v19  ;;  %v2400_v19 = vld [vmem:[%s2919_s19 + $0x20] sm:$0xff]  }
 0x4e1   : > { %v1446_v33 = vmul.f32 %v2098_v30, %v1439_v31 }
 0x4e3   : > { %v1453_v34 = vadd.f32 %v2099_v32, %v1446_v33 }
 0x4e5   : > { %v1454_v35 = vmax.f32 %v1453_v34, 0.0 }
 0x4e7   : > { %v1455_v36 = vpack.c.bf16 %v1454_v35, %v1454_v35 }
 0x4e9   : > { %2260 = vmatmul.mubr.bf16.vlgmr.msra.gmra.mrb[4].mxu0 %v1455_v36 }
 0x4ea   : > { %2299 = vmatprep.mubr.msk.bf16.mxu0 %vm2430_vm2, %v2429_v46  ;;  %2284 = vmatpush3.bf16.msra.mxu0 %v2396_v15 }
 0x4eb   : > { %2285 = vmatprep.subr.bf16.mxu0 %v2429_v46 }
 0x4ee   : > { %2286 = vmatpush3.bf16.msra.mxu0 %v2397_v16 }
 0x4ef   : > { %2287 = vmatprep.subr.bf16.mxu0 %v2429_v46 }
 0x4f2   : > { %2288 = vmatpush3.bf16.msra.mxu0 %v2398_v17 }
 0x4f3   : > { %2289 = vmatprep.subr.bf16.mxu0 %v2429_v46 }
 0x4f6   : > { %2290 = vmatpush3.bf16.msra.mxu0 %v2399_v18 }
 0x4f7   : > { %2291 = vmatprep.subr.bf16.mxu0 %v2429_v46 }
 0x4fa   : > { %2292 = vmatpush3.bf16.msra.mxu0 %v2400_v19 }
 0x4fb   : > { %2293 = vmatprep.subr.bf16.mxu0 %v2429_v46 }
 0x4fe   : > { %2294 = vmatpush3.bf16.msra.mxu0 %v2401_v20 }
 0x4ff   : > { %2295 = vmatprep.subr.bf16.mxu0 %v2429_v46 }
 0x502   : > { %2296 = vmatpush3.bf16.msra.mxu0 %v2402_v48 }
 0x503   : > { %2297 = vmatprep.subr.bf16.mxu0 %v2429_v46 }
 0x506   : > { %2298 = vmatpush3.bf16.msra.mxu0 %v2403_v21 }
 0x5bc   : > { %v1554_v45 = vpop.f32.mrb[4].mxu0 }
 0x5bd   : > { %v1562_v47 = vmul.f32 %v2743_v6, %v1554_v45  ;;  %v2261_v49 = vpop.f32.mrb[5].mxu0 }
 0x5be   : > { %v1557_v50 = vpop.f32.mrb[6].mxu0 }
 0x5bf   : > { %v1563_v51 = vrot.slane %v1562_v47, 4  ;;  %v2262_v52 = vpop.f32.mrb[7].mxu0  ;;  %v2119_v50 = vld [vmem:[%s2921_s23] ss:$0 sm:$0xff] }
 0x5c1   : > { %v1564_v53 = vadd.f32 %v1563_v51, %v1562_v47  ;;  %v2118_v47 = vld [vmem:[%s2920_s27] ss:$0 sm:$0xff] }
 0x5c3   : > { %v1565_v54 = vrot.slane %v1564_v53, 2 }
 0x5c5   : > { %v1566_v55 = vadd.f32 %v1565_v54, %v1564_v53  ;;  %v2404_v53 = vld [vmem:[%s2922_s18] sm:$0xff]   ;;  %v2405_v54 = vld [vmem:[%s2922_s18 + $0x8] sm:$0xff]  }
 0x5c7   : > { %v1567_v56 = vrot.slane %v1566_v55, 1 }
 0x5c9   : > { %v1568_v57 = vadd.f32 %v1567_v56, %v1566_v55  ;;  %v2406_v55 = vld [vmem:[%s2922_s18 + $0x10] sm:$0xff]   ;;  %v2407_v56 = vld [vmem:[%s2922_s18 + $0x18] sm:$0xff]  }
 0x5cb   : > { %v1569_v58 = vmul.f32 0.5, %v1568_v57  ;;  %v2120_v57 = vld [vmem:[%s2923_s24] ss:$0 sm:$0xff] }
 0x5cd   : > { %v1570_v59 = vsub.f32 %v1554_v45, %v1569_v58 }
 0x5cf   : > { %v1571_v60 = vmul.f32 %v1570_v59, %v1570_v59 }
 0x5d1   : > { %v1572_v61 = vmul.f32 %v2743_v6, %v1571_v60 }
 0x5d3   : > { %v1573_v62 = vrot.slane %v1572_v61, 4 }
 0x5d5   : > { %v1574_v63 = vadd.f32 %v1573_v62, %v1572_v61 }
 0x5d7   : > { %v1575_v0 = vrot.slane %v1574_v63, 2 }
 0x5d9   : > { %v1576_v1 = vadd.f32 %v1575_v0, %v1574_v63 }
 0x5db   : > { %v1577_v2 = vrot.slane %v1576_v1, 1 }
 0x5dd   : > { %v1578_v3 = vadd.f32 %v1577_v2, %v1576_v1 }
 0x5df   : > { %v1579_v4 = vmul.f32 0.5, %v1578_v3 }
 0x5e1   : > { %v1580_v5 = vadd.f32 1e-05, %v1579_v4 }
 0x5e3   : > { %2410 = vrsqrt.f32 %v1580_v5 }
 0x5ed   : > { %v2411_v7 = vpop.eup %2410 }
 0x5ee   : > { %v1582_v9 = vmul.f32 %v2411_v7, %v1570_v59 }
 0x5f0   : > { %v1589_v11 = vmul.f32 %v2108_v8, %v1582_v9  ;;  %v2129_v9 = vld [vmem:[%s2924_s1] ss:$0 sm:$0xff] }
 0x5f2   : > { %v1596_v12 = vadd.f32 %v2109_v10, %v1589_v11 }
 0x5f4   : > { %v1597_v13 = vmax.f32 %v1596_v12, 0.0 }
 0x5f6   : > { %v1598_v14 = vpack.c.bf16 %v1597_v13, %v1597_v13 }
 0x5f8   : > { %2280 = vmatmul.mubr.bf16.vlgmr.msra.gmra.mrb[4].mxu1 %v1598_v14 }
 0x5f9   : > { %2311 = vmatprep.mubr.msk.bf16.mxu1 %vm2430_vm2, %v2429_v46  ;;  %2304 = vmatpush3.bf16.msra.mxu1 %v2404_v53 }
 0x5fa   : > { %2305 = vmatprep.subr.bf16.mxu1 %v2429_v46 }
 0x5fd   : > { %2306 = vmatpush3.bf16.msra.mxu1 %v2405_v54 }
 0x5fe   : > { %2307 = vmatprep.subr.bf16.mxu1 %v2429_v46 }
 0x601   : > { %2308 = vmatpush3.bf16.msra.mxu1 %v2406_v55 }
 0x602   : > { %2309 = vmatprep.subr.bf16.mxu1 %v2429_v46 }
 0x605   : > { %2310 = vmatpush3.bf16.msra.mxu1 %v2407_v56 }
 0x6cb   : > { %v1697_v22 = vpop.f32.mrb[4].mxu1 }
 0x6cc   : > { %v1705_v23 = vmul.f32 %v2743_v6, %v1697_v22  ;;  %v2281_v24 = vpop.f32.mrb[5].mxu1 }
 0x6cd   : > { %v1700_v25 = vpop.f32.mrb[6].mxu1 }
 0x6ce   : > { %v1706_v26 = vrot.slane %v1705_v23, 4  ;;  %v2282_v27 = vpop.f32.mrb[7].mxu1 }
 0x6d0   : > { %v1707_v28 = vadd.f32 %v1706_v26, %v1705_v23 }
 0x6d2   : > { %v1708_v29 = vrot.slane %v1707_v28, 2 }
 0x6d4   : > { %v1709_v30 = vadd.f32 %v1708_v29, %v1707_v28 }
 0x6d6   : > { %v1710_v31 = vrot.slane %v1709_v30, 1 }
 0x6d8   : > { %v1711_v32 = vadd.f32 %v1710_v31, %v1709_v30 }
 0x6da   : > { %v1712_v33 = vmul.f32 0.5, %v1711_v32 }
 0x6dc   : > { %v1713_v34 = vsub.f32 %v1697_v22, %v1712_v33 }
 0x6de   : > { %v1714_v35 = vmul.f32 %v1713_v34, %v1713_v34 }
 0x6e0   : > { %v1715_v36 = vmul.f32 %v2743_v6, %v1714_v35 }
 0x6e2   : > { %v1716_v37 = vrot.slane %v1715_v36, 4 }
 0x6e4   : > { %v1717_v38 = vadd.f32 %v1716_v37, %v1715_v36 }
 0x6e6   : > { %v1718_v39 = vrot.slane %v1717_v38, 2 }
 0x6e8   : > { %v1719_v40 = vadd.f32 %v1718_v39, %v1717_v38 }
 0x6ea   : > { %v1720_v41 = vrot.slane %v1719_v40, 1 }
 0x6ec   : > { %v1721_v42 = vadd.f32 %v1720_v41, %v1719_v40 }
 0x6ee   : > { %v1722_v43 = vmul.f32 0.5, %v1721_v42 }
 0x6f0   : > { %v1723_v44 = vadd.f32 1e-05, %v1722_v43 }
 0x6f2   : > { %2412 = vrsqrt.f32 %v1723_v44 }
 0x6fc   : > { %v2413_v45 = vpop.eup %2412 }
 0x6fd   : > { %v1725_v49 = vmul.f32 %v2413_v45, %v1713_v34 }
 0x6ff   : > { %v1732_v6 = vmul.f32 %v2118_v47, %v1725_v49 }
 0x701   : > { %v1739_v51 = vadd.f32 %v2119_v50, %v1732_v6 }
 0x703   : > { %v1740_v52 = vpack.c.bf16 %v1739_v51, %v1739_v51 }
 0x705   : > { %2300 = vmatmul.mubr.bf16.vlgmr.msra.gmra.mrb[8].mxu0 %v1740_v52 }
 0x7d8   : > { %v1846_v58 = vpop.f32.mrb[8].mxu0 }
 0x7d9   : > { %v1847_v59 = vadd.f32 %v2120_v57, %v1846_v58  ;;  %v2301_v60 = vpop.f32.mrb[9].mxu0 }
 0x7da   : > { %v1849_v61 = vpop.f32.mrb[10].mxu0 }
 0x7db   : > { %v1853_v62 = vand.u32 2147483647, %v1847_v59  ;;  %v2302_v63 = vpop.f32.mrb[11].mxu0  ;;  %v1852_v4 = vmax.f32 %v1847_v59, 0.0 }
 0x7dd   : > { %v1854_v0 = vsub.f32 0.0, %v1853_v62 }
 0x7df   : > { %v1855_v1 = vmul.f32 1.442695, %v1854_v0 }
 0x7e1   : > { %2414 = vpow2.f32 %v1855_v1 }
 0x7eb   : > { %v2415_v2 = vpop.eup %2414 }
 0x7ec   : > { %v1857_v46 = vadd.f32 1.0, %v2415_v2 }
 0x7ee   : > { %2416 = vlog2.f32 %v1857_v46 }
 0x7f8   : > { %v2417_v3 = vpop.eup %2416 }
 0x7f9   : > { %v1859_v5 = vmul.f32 0.6931472, %v2417_v3 }
 0x7fb   : > { %v1860_v7 = vadd.f32 %v1859_v5, %v1852_v4 }
 0x7fd   : > { %v1861_v8 = vpack.c.bf16 %v1860_v7, %v1860_v7 }
 0x7ff   : > { %2312 = vmatmul.mubr.msk.bf16.vlgmr.msra.gmra.mrb[8].mxu1 %vm1901_vm4, %v1861_v8 }
 0x8d2   : > { %v1939_v10 = vpop.f32.mrb[8].mxu1 }
 0x8d3   : > { %v1940_v11 = vadd.f32 %v2129_v9, %v1939_v10  ;;  %v2313_v12 = vpop.f32.mrb[9].mxu1 }
 0x8d4   : > { %v1942_v13 = vpop.f32.mrb[10].mxu1 }
 0x8d5   : > { %1945 = vst [vmem:[%s2925_s26] sm:$0xff] %v1940_v11  ;;  %v2314_v14 = vpop.f32.mrb[11].mxu1 }
 0x8d6 PF: > { %s2926_s2 = sld [smem:[#allocation3_spill]] }
 0x8dc   : > { %s33_s4 = sadd.s32 1, %s2926_s2  }
 0x8dd   : > { %p30_p6 = scmp.ge.s32.totalorder %s33_s4, 7  }
 0x8df   :  { %32 = sbr.rel (!%p30_p6) target bundleno = 18 (0x12), region = 164 }

</bundles_post_ra>
